<compile_context>
chip_gen: v7x
topology: tpu7x:2x2x1
jax: 0.10.0
libtpu: 0.0.40
codegen_flags: <defaults>
</compile_context>

<pallas_src>
import math
import functools

import jax
import jax.numpy as jnp
from jax.experimental import pallas as pl
from jax.experimental.pallas import tpu as pltpu


def _layernorm(x, gamma, beta, eps=1e-12):
    u = jnp.mean(x, axis=-1, keepdims=True)
    xc = x - u
    s = jnp.mean(xc * xc, axis=-1, keepdims=True)
    # rsqrt lowers to the EUP (own VLIW slot) instead of a VALU divide pass.
    return xc * jax.lax.rsqrt(s + eps) * gamma + beta


def _gelu(x):
    # erf-based gelu, exactly as in the reference PyTorch code
    return x * 0.5 * (1.0 + jax.lax.erf(x * (1.0 / math.sqrt(2.0))))


def cross_layer_kernel(
    key_ref, query_ref, other_ref,
    wq_ref, bq_ref, wk_ref, bk_ref, wv_ref, bv_ref,
    wso_ref, bso_ref, g1_ref, b1_ref,
    wi_ref, bi_ref, wo_ref, bo_ref, g2_ref, b2_ref,
    out_ref, *, head_size,
):
    f32 = jnp.float32
    bf16 = jnp.bfloat16

    q_in = query_ref[...]          # [Bb, Sq, H] f32
    k_in = key_ref[...]            # [Bb, Sk, H] f32
    res = other_ref[...]           # [Bb, Sq, H] f32
    Bb, Sq, H = q_in.shape
    Sk = k_in.shape[1]

    # Row-pack the batch tile so the MXU sees M = Bb*Sq / Bb*Sk rows.
    q2 = q_in.reshape(Bb * Sq, H)
    k2 = k_in.reshape(Bb * Sk, H)
    r2 = res.reshape(Bb * Sq, H)

    # --- BertCrossAttention (num_heads = 1): bf16 MXU operands, f32 accumulation ---
    q = jnp.dot(q2.astype(bf16), wq_ref[...], preferred_element_type=f32) + bq_ref[...]
    k = jnp.dot(k2.astype(bf16), wk_ref[...], preferred_element_type=f32) + bk_ref[...]
    v = jnp.dot(k2.astype(bf16), wv_ref[...], preferred_element_type=f32) + bv_ref[...]

    # Fold 1/sqrt(d) into q once ([M,H]) instead of scaling the [Sq,Sk] scores tile.
    q = q * (1.0 / math.sqrt(head_size))

    qb = q.reshape(Bb, Sq, H).astype(bf16)
    kb = k.reshape(Bb, Sk, H).astype(bf16)
    vb = v.reshape(Bb, Sk, H).astype(bf16)

    # Scores contract the last dims directly (no k.T).  The module's
    # "attention_mask = scores*0 + 1" adds a row-constant -> softmax no-op -> dropped.
    scores = jnp.einsum("bqh,bkh->bqk", qb, kb, preferred_element_type=f32)
    scores = scores - jnp.max(scores, axis=-1, keepdims=True)
    p = jnp.exp(scores)
    inv_denom = pl.reciprocal(jnp.sum(p, axis=-1, keepdims=True), approx=True)
    probs = p * inv_denom
    ctx = jnp.einsum("bqk,bkh->bqh", probs.astype(bf16), vb,
                     preferred_element_type=f32)
    ctx2 = ctx.reshape(Bb * Sq, H)

    # --- BertSelfOutput ---
    so = jnp.dot(ctx2.astype(bf16), wso_ref[...], preferred_element_type=f32) + bso_ref[...]
    attn = _layernorm(so + q2, g1_ref[...], b1_ref[...])          # f32

    # --- BertIntermediate (on attention_output + other_res) ---
    inter = _gelu(
        jnp.dot((attn + r2).astype(bf16), wi_ref[...], preferred_element_type=f32)
        + bi_ref[...]
    )

    # --- BertOutput ---
    oo = jnp.dot(inter.astype(bf16), wo_ref[...], preferred_element_type=f32) + bo_ref[...]
    out = _layernorm(oo + attn, g2_ref[...], b2_ref[...])
    out_ref[...] = out.reshape(Bb, Sq, H).astype(out_ref.dtype)


_WEIGHT_ORDER = ("wq", "bq", "wk", "bk", "wv", "bv", "wso", "bso",
                 "g1", "b1", "wi", "bi", "wo", "bo", "g2", "b2")
_MATMUL_WEIGHTS = frozenset({"wq", "wk", "wv", "wso", "wi", "wo"})


def _pick_block_b(B, Sq, Sk, target_rows=256):
    # Largest divisor of B that keeps the packed matmul M-dim around the MXU width.
    # (For very long Sq, the right move is tiling over query blocks instead; at
    #  block_b=1 this wrapper degenerates to one batch element per grid step.)
    best = 1
    longest = max(Sq, Sk, 1)
    for cand in range(1, B + 1):
        if B % cand == 0 and cand * longest <= max(target_rows, longest):
            best = cand
    return best


def _vmem_limit_bytes(block_b, Sq, Sk, H, I):
    f32b, bf16b = 4, 2
    weights = bf16b * (4 * H * H + 2 * H * I) + f32b * (7 * H + I)
    io = f32b * block_b * (3 * Sq * H + Sk * H)
    work = f32b * block_b * (3 * Sq * Sk + 2 * Sq * I + 4 * (Sq + Sk) * H)
    est = 2 * weights + 2 * io + work          # conservative (double-buffer worst case)
    return min(max(int(1.4 * est), 32 * 2 ** 20), 64 * 2 ** 20)


def cross_layer_with_res_link(key_t, query_t, other_res, params, *, block_b=None):
    B, Sq, H = query_t.shape
    _, Sk, _ = key_t.shape
    I = params["wi"].shape[1]
    head_size = H  # num_attention_heads = 1 -> the single head spans full hidden width

    if block_b is None:
        block_b = _pick_block_b(B, Sq, Sk)
    assert B % block_b == 0

    # Matmul weights go to the MXU in bf16 (halves weight DMA + VMEM footprint);
    # biases / LayerNorm params stay f32 (added after f32 accumulation).
    weight_args = [
        params[name].astype(jnp.bfloat16 if name in _MATMUL_WEIGHTS else jnp.float32)
        for name in _WEIGHT_ORDER
    ]

    def seq_spec(S):
        return pl.BlockSpec((block_b, S, H), lambda b: (b, 0, 0))

    def build(single_buffer_weights):
        def w_spec(arr):
            idx = lambda b: (0,) * arr.ndim
            if single_buffer_weights:
                # Grid-invariant weights: single-buffer to halve their VMEM footprint.
                return pl.BlockSpec(arr.shape, idx, pipeline_mode=pl.Buffered(1))
            return pl.BlockSpec(arr.shape, idx)

        weight_specs = [w_spec(w) for w in weight_args]
        kernel = functools.partial(cross_layer_kernel, head_size=head_size)
        return pl.pallas_call(
            kernel,
            out_shape=jax.ShapeDtypeStruct((B, Sq, H), jnp.float32),
            grid_spec=pltpu.PrefetchScalarGridSpec(
                num_scalar_prefetch=0,
                grid=(B // block_b,),
                in_specs=[seq_spec(Sk), seq_spec(Sq), seq_spec(Sq)] + weight_specs,
                out_specs=seq_spec(Sq),
            ),
            compiler_params=pltpu.CompilerParams(
                dimension_semantics=("parallel",),
                vmem_limit_bytes=_vmem_limit_bytes(block_b, Sq, Sk, H, I),
            ),
        )

    args = (key_t, query_t, other_res, *weight_args)
    try:
        return jax.block_until_ready(build(True)(*args))
    except Exception:
        # pipeline_mode=pl.Buffered(1) unsupported on this jax build: fall back to
        # default (double-buffered) weight specs; everything else is unchanged.
        return build(False)(*args)


def make_params(key, hidden, intermediate):
    ks = jax.random.split(key, 8)
    std = 0.02
    return {
        "wq": jax.random.normal(ks[0], (hidden, hidden), jnp.float32) * std,
        "bq": jnp.zeros((1, hidden), jnp.float32),
        "wk": jax.random.normal(ks[1], (hidden, hidden), jnp.float32) * std,
        "bk": jnp.zeros((1, hidden), jnp.float32),
        "wv": jax.random.normal(ks[2], (hidden, hidden), jnp.float32) * std,
        "bv": jnp.zeros((1, hidden), jnp.float32),
        "wso": jax.random.normal(ks[3], (hidden, hidden), jnp.float32) * std,
        "bso": jnp.zeros((1, hidden), jnp.float32),
        "g1": jnp.ones((1, hidden), jnp.float32),
        "b1": jnp.zeros((1, hidden), jnp.float32),
        "wi": jax.random.normal(ks[4], (hidden, intermediate), jnp.float32) * std,
        "bi": jnp.zeros((1, intermediate), jnp.float32),
        "wo": jax.random.normal(ks[5], (intermediate, hidden), jnp.float32) * std,
        "bo": jnp.zeros((1, hidden), jnp.float32),
        "g2": jnp.ones((1, hidden), jnp.float32),
        "b2": jnp.zeros((1, hidden), jnp.float32),
    }


def reference(key_t, query_t, other_res, p):
    # pure-JAX f32 reference of the PyTorch forward (eval mode, num_heads=1)
    def ln(x, g, b, eps=1e-12):
        u = jnp.mean(x, -1, keepdims=True)
        s = jnp.mean((x - u) ** 2, -1, keepdims=True)
        return (x - u) / jnp.sqrt(s + eps) * g + b

    H = query_t.shape[-1]
    q = query_t @ p["wq"] + p["bq"]
    k = key_t @ p["wk"] + p["bk"]
    v = key_t @ p["wv"] + p["bv"]
    scores = jnp.einsum("bqh,bkh->bqk", q, k) / math.sqrt(H) + 1.0
    probs = jax.nn.softmax(scores, axis=-1)
    ctx = jnp.einsum("bqk,bkh->bqh", probs, v)
    attn = ln(ctx @ p["wso"] + p["bso"] + query_t, p["g1"], p["b1"])
    inter = jax.nn.gelu((attn + other_res) @ p["wi"] + p["bi"], approximate=False)
    return ln(inter @ p["wo"] + p["bo"] + attn, p["g2"], p["b2"])


if __name__ == "__main__":
    B, Sq, Sk, H, I = 2, 8, 8, 32, 64
    root = jax.random.PRNGKey(0)
    kk, kq, kr, kp = jax.random.split(root, 4)
    key_t = jax.random.normal(kk, (B, Sk, H), jnp.float32)
    query_t = jax.random.normal(kq, (B, Sq, H), jnp.float32)
    other_res = jax.random.normal(kr, (B, Sq, H), jnp.float32)
    params = make_params(kp, H, I)

    out = cross_layer_with_res_link(key_t, query_t, other_res, params)
    out = jax.block_until_ready(out)

    ref = reference(key_t, query_t, other_res, params)
    assert out.shape == (B, Sq, H)
    assert bool(jnp.all(jnp.isfinite(out)))
    # bf16 MXU operands with f32 accumulation vs. an all-f32 reference
    assert bool(jnp.allclose(out, ref, rtol=3e-2, atol=3e-2))
    print("KERNEL_OK")
</pallas_src>

<mosaic_0001>
module attributes {stable_mosaic.version = 11 : i64} {
  func.func @cross_layer_kernel(%arg0: i32, %arg1: memref<2x8x32xf32, #tpu.memory_space<vmem>>, %arg2: memref<2x8x32xf32, #tpu.memory_space<vmem>>, %arg3: memref<2x8x32xf32, #tpu.memory_space<vmem>>, %arg4: memref<32x32xbf16, #tpu.memory_space<vmem>>, %arg5: memref<1x32xf32, #tpu.memory_space<vmem>>, %arg6: memref<32x32xbf16, #tpu.memory_space<vmem>>, %arg7: memref<1x32xf32, #tpu.memory_space<vmem>>, %arg8: memref<32x32xbf16, #tpu.memory_space<vmem>>, %arg9: memref<1x32xf32, #tpu.memory_space<vmem>>, %arg10: memref<32x32xbf16, #tpu.memory_space<vmem>>, %arg11: memref<1x32xf32, #tpu.memory_space<vmem>>, %arg12: memref<1x32xf32, #tpu.memory_space<vmem>>, %arg13: memref<1x32xf32, #tpu.memory_space<vmem>>, %arg14: memref<32x64xbf16, #tpu.memory_space<vmem>>, %arg15: memref<1x64xf32, #tpu.memory_space<vmem>>, %arg16: memref<64x32xbf16, #tpu.memory_space<vmem>>, %arg17: memref<1x32xf32, #tpu.memory_space<vmem>>, %arg18: memref<1x32xf32, #tpu.memory_space<vmem>>, %arg19: memref<1x32xf32, #tpu.memory_space<vmem>>, %arg20: memref<2x8x32xf32, #tpu.memory_space<vmem>>) attributes {dimension_semantics = [#tpu.dimension_semantics<parallel>], iteration_bounds = array<i64: 1>, scalar_prefetch = 0 : i64, scratch_operands = 0 : i64, tpu.core_type = #tpu.core_type<tc>, window_params = [{transform_indices = @transform_0, window_bounds = array<i64: 2, 8, 32>}, {transform_indices = @transform_1, window_bounds = array<i64: 2, 8, 32>}, {transform_indices = @transform_2, window_bounds = array<i64: 2, 8, 32>}, {pipeline_mode = #tpu.pipeline_mode<synchronous>, transform_indices = @transform_3, window_bounds = array<i64: 32, 32>}, {pipeline_mode = #tpu.pipeline_mode<synchronous>, transform_indices = @transform_4, window_bounds = array<i64: 1, 32>}, {pipeline_mode = #tpu.pipeline_mode<synchronous>, transform_indices = @transform_5, window_bounds = array<i64: 32, 32>}, {pipeline_mode = #tpu.pipeline_mode<synchronous>, transform_indices = @transform_6, window_bounds = array<i64: 1, 32>}, {pipeline_mode = #tpu.pipeline_mode<synchronous>, transform_indices = @transform_7, window_bounds = array<i64: 32, 32>}, {pipeline_mode = #tpu.pipeline_mode<synchronous>, transform_indices = @transform_8, window_bounds = array<i64: 1, 32>}, {pipeline_mode = #tpu.pipeline_mode<synchronous>, transform_indices = @transform_9, window_bounds = array<i64: 32, 32>}, {pipeline_mode = #tpu.pipeline_mode<synchronous>, transform_indices = @transform_10, window_bounds = array<i64: 1, 32>}, {pipeline_mode = #tpu.pipeline_mode<synchronous>, transform_indices = @transform_11, window_bounds = array<i64: 1, 32>}, {pipeline_mode = #tpu.pipeline_mode<synchronous>, transform_indices = @transform_12, window_bounds = array<i64: 1, 32>}, {pipeline_mode = #tpu.pipeline_mode<synchronous>, transform_indices = @transform_13, window_bounds = array<i64: 32, 64>}, {pipeline_mode = #tpu.pipeline_mode<synchronous>, transform_indices = @transform_14, window_bounds = array<i64: 1, 64>}, {pipeline_mode = #tpu.pipeline_mode<synchronous>, transform_indices = @transform_15, window_bounds = array<i64: 64, 32>}, {pipeline_mode = #tpu.pipeline_mode<synchronous>, transform_indices = @transform_16, window_bounds = array<i64: 1, 32>}, {pipeline_mode = #tpu.pipeline_mode<synchronous>, transform_indices = @transform_17, window_bounds = array<i64: 1, 32>}, {pipeline_mode = #tpu.pipeline_mode<synchronous>, transform_indices = @transform_18, window_bounds = array<i64: 1, 32>}, {transform_indices = @transform_19, window_bounds = array<i64: 2, 8, 32>}]} {
    %c0 = arith.constant 0 : index
    %c0_0 = arith.constant 0 : index
    %c0_1 = arith.constant 0 : index
    %0 = vector.load %arg2[%c0, %c0_0, %c0_1] : memref<2x8x32xf32, #tpu.memory_space<vmem>>, vector<2x8x32xf32>
    %c0_2 = arith.constant 0 : index
    %c0_3 = arith.constant 0 : index
    %c0_4 = arith.constant 0 : index
    %1 = vector.load %arg1[%c0_2, %c0_3, %c0_4] : memref<2x8x32xf32, #tpu.memory_space<vmem>>, vector<2x8x32xf32>
    %c0_5 = arith.constant 0 : index
    %c0_6 = arith.constant 0 : index
    %c0_7 = arith.constant 0 : index
    %2 = vector.load %arg3[%c0_5, %c0_6, %c0_7] : memref<2x8x32xf32, #tpu.memory_space<vmem>>, vector<2x8x32xf32>
    %3 = vector.shape_cast %0 : vector<2x8x32xf32> to vector<16x32xf32>
    %4 = vector.shape_cast %1 : vector<2x8x32xf32> to vector<16x32xf32>
    %5 = vector.shape_cast %2 : vector<2x8x32xf32> to vector<16x32xf32>
    %6 = arith.truncf %3 : vector<16x32xf32> to vector<16x32xbf16>
    %c0_8 = arith.constant 0 : index
    %c0_9 = arith.constant 0 : index
    %7 = vector.load %arg4[%c0_8, %c0_9] : memref<32x32xbf16, #tpu.memory_space<vmem>>, vector<32x32xbf16>
    %cst = arith.constant dense<0.000000e+00> : vector<16x32xf32>
    %8 = tpu.matmul %6, %7, %cst {dimension_numbers = #tpu.dot_dimension_numbers<[1], [0], [0], [1], [0, 0, 1, 1], [], []>} : vector<16x32xbf16>, vector<32x32xbf16>, vector<16x32xf32> -> vector<16x32xf32>
    %c0_10 = arith.constant 0 : index
    %c0_11 = arith.constant 0 : index
    %9 = vector.load %arg5[%c0_10, %c0_11] : memref<1x32xf32, #tpu.memory_space<vmem>>, vector<1x32xf32>
    %10 = vector.broadcast %9 : vector<1x32xf32> to vector<16x32xf32>
    %11 = arith.addf %8, %10 : vector<16x32xf32>
    %12 = arith.truncf %4 : vector<16x32xf32> to vector<16x32xbf16>
    %c0_12 = arith.constant 0 : index
    %c0_13 = arith.constant 0 : index
    %13 = vector.load %arg6[%c0_12, %c0_13] : memref<32x32xbf16, #tpu.memory_space<vmem>>, vector<32x32xbf16>
    %cst_14 = arith.constant dense<0.000000e+00> : vector<16x32xf32>
    %14 = tpu.matmul %12, %13, %cst_14 {dimension_numbers = #tpu.dot_dimension_numbers<[1], [0], [0], [1], [0, 0, 1, 1], [], []>} : vector<16x32xbf16>, vector<32x32xbf16>, vector<16x32xf32> -> vector<16x32xf32>
    %c0_15 = arith.constant 0 : index
    %c0_16 = arith.constant 0 : index
    %15 = vector.load %arg7[%c0_15, %c0_16] : memref<1x32xf32, #tpu.memory_space<vmem>>, vector<1x32xf32>
    %16 = vector.broadcast %15 : vector<1x32xf32> to vector<16x32xf32>
    %17 = arith.addf %14, %16 : vector<16x32xf32>
    %18 = arith.truncf %4 : vector<16x32xf32> to vector<16x32xbf16>
    %c0_17 = arith.constant 0 : index
    %c0_18 = arith.constant 0 : index
    %19 = vector.load %arg8[%c0_17, %c0_18] : memref<32x32xbf16, #tpu.memory_space<vmem>>, vector<32x32xbf16>
    %cst_19 = arith.constant dense<0.000000e+00> : vector<16x32xf32>
    %20 = tpu.matmul %18, %19, %cst_19 {dimension_numbers = #tpu.dot_dimension_numbers<[1], [0], [0], [1], [0, 0, 1, 1], [], []>} : vector<16x32xbf16>, vector<32x32xbf16>, vector<16x32xf32> -> vector<16x32xf32>
    %c0_20 = arith.constant 0 : index
    %c0_21 = arith.constant 0 : index
    %21 = vector.load %arg9[%c0_20, %c0_21] : memref<1x32xf32, #tpu.memory_space<vmem>>, vector<1x32xf32>
    %22 = vector.broadcast %21 : vector<1x32xf32> to vector<16x32xf32>
    %23 = arith.addf %20, %22 : vector<16x32xf32>
    %cst_22 = arith.constant 0.176776692 : f32
    %24 = vector.broadcast %cst_22 : f32 to vector<16x32xf32>
    %25 = arith.mulf %11, %24 : vector<16x32xf32>
    %26 = vector.shape_cast %25 : vector<16x32xf32> to vector<2x8x32xf32>
    %27 = arith.truncf %26 : vector<2x8x32xf32> to vector<2x8x32xbf16>
    %28 = vector.shape_cast %17 : vector<16x32xf32> to vector<2x8x32xf32>
    %29 = arith.truncf %28 : vector<2x8x32xf32> to vector<2x8x32xbf16>
    %30 = vector.shape_cast %23 : vector<16x32xf32> to vector<2x8x32xf32>
    %31 = arith.truncf %30 : vector<2x8x32xf32> to vector<2x8x32xbf16>
    "tpu.trace_start"() <{level = 10 : i32, message = "bqh,bkh->bqk"}> : () -> ()
    %cst_23 = arith.constant dense<0.000000e+00> : vector<2x8x8xf32>
    %32 = tpu.matmul %27, %29, %cst_23 {dimension_numbers = #tpu.dot_dimension_numbers<[2], [2], [1], [1], [0, 0, 0, 1, 1, 1], [0], [0]>} : vector<2x8x32xbf16>, vector<2x8x32xbf16>, vector<2x8x8xf32> -> vector<2x8x8xf32>
    "tpu.trace_stop"() : () -> ()
    %cst_24 = arith.constant dense<0xFF800000> : vector<2x8xf32>
    %33 = vector.multi_reduction <maximumf>, %32, %cst_24 [2] : vector<2x8x8xf32> to vector<2x8xf32>
    %34 = vector.shape_cast %33 : vector<2x8xf32> to vector<2x8x1xf32>
    %35 = vector.broadcast %34 : vector<2x8x1xf32> to vector<2x8x8xf32>
    %36 = arith.subf %32, %35 : vector<2x8x8xf32>
    %37 = math.exp %36 : vector<2x8x8xf32>
    %cst_25 = arith.constant dense<0.000000e+00> : vector<2x8xf32>
    %38 = vector.multi_reduction <add>, %37, %cst_25 [2] : vector<2x8x8xf32> to vector<2x8xf32>
    %39 = vector.shape_cast %38 : vector<2x8xf32> to vector<2x8x1xf32>
    %40 = tpu.reciprocal %39 {approx = true} : vector<2x8x1xf32> -> vector<2x8x1xf32>
    %41 = vector.broadcast %40 : vector<2x8x1xf32> to vector<2x8x8xf32>
    %42 = arith.mulf %37, %41 : vector<2x8x8xf32>
    %43 = arith.truncf %42 : vector<2x8x8xf32> to vector<2x8x8xbf16>
    "tpu.trace_start"() <{level = 10 : i32, message = "bqk,bkh->bqh"}> : () -> ()
    %cst_26 = arith.constant dense<0.000000e+00> : vector<2x8x32xf32>
    %44 = tpu.matmul %43, %31, %cst_26 {dimension_numbers = #tpu.dot_dimension_numbers<[2], [1], [1], [2], [0, 0, 0, 1, 1, 2], [0], [0]>} : vector<2x8x8xbf16>, vector<2x8x32xbf16>, vector<2x8x32xf32> -> vector<2x8x32xf32>
    "tpu.trace_stop"() : () -> ()
    %45 = vector.shape_cast %44 : vector<2x8x32xf32> to vector<16x32xf32>
    %46 = arith.truncf %45 : vector<16x32xf32> to vector<16x32xbf16>
    %c0_27 = arith.constant 0 : index
    %c0_28 = arith.constant 0 : index
    %47 = vector.load %arg10[%c0_27, %c0_28] : memref<32x32xbf16, #tpu.memory_space<vmem>>, vector<32x32xbf16>
    %cst_29 = arith.constant dense<0.000000e+00> : vector<16x32xf32>
    %48 = tpu.matmul %46, %47, %cst_29 {dimension_numbers = #tpu.dot_dimension_numbers<[1], [0], [0], [1], [0, 0, 1, 1], [], []>} : vector<16x32xbf16>, vector<32x32xbf16>, vector<16x32xf32> -> vector<16x32xf32>
    %c0_30 = arith.constant 0 : index
    %c0_31 = arith.constant 0 : index
    %49 = vector.load %arg11[%c0_30, %c0_31] : memref<1x32xf32, #tpu.memory_space<vmem>>, vector<1x32xf32>
    %50 = vector.broadcast %49 : vector<1x32xf32> to vector<16x32xf32>
    %51 = arith.addf %48, %50 : vector<16x32xf32>
    %52 = arith.addf %51, %3 : vector<16x32xf32>
    %c0_32 = arith.constant 0 : index
    %c0_33 = arith.constant 0 : index
    %53 = vector.load %arg12[%c0_32, %c0_33] : memref<1x32xf32, #tpu.memory_space<vmem>>, vector<1x32xf32>
    %c0_34 = arith.constant 0 : index
    %c0_35 = arith.constant 0 : index
    %54 = vector.load %arg13[%c0_34, %c0_35] : memref<1x32xf32, #tpu.memory_space<vmem>>, vector<1x32xf32>
    %cst_36 = arith.constant dense<0.000000e+00> : vector<16xf32>
    %55 = vector.multi_reduction <add>, %52, %cst_36 [1] : vector<16x32xf32> to vector<16xf32>
    %56 = vector.shape_cast %55 : vector<16xf32> to vector<16x1xf32>
    %cst_37 = arith.constant 3.200000e+01 : f32
    %57 = vector.broadcast %cst_37 : f32 to vector<16x1xf32>
    %58 = arith.divf %56, %57 : vector<16x1xf32>
    %59 = vector.broadcast %58 : vector<16x1xf32> to vector<16x32xf32>
    %60 = arith.subf %52, %59 : vector<16x32xf32>
    %61 = arith.mulf %60, %60 : vector<16x32xf32>
    %cst_38 = arith.constant dense<0.000000e+00> : vector<16xf32>
    %62 = vector.multi_reduction <add>, %61, %cst_38 [1] : vector<16x32xf32> to vector<16xf32>
    %63 = vector.shape_cast %62 : vector<16xf32> to vector<16x1xf32>
    %cst_39 = arith.constant 3.200000e+01 : f32
    %64 = vector.broadcast %cst_39 : f32 to vector<16x1xf32>
    %65 = arith.divf %63, %64 : vector<16x1xf32>
    %cst_40 = arith.constant 9.99999996E-13 : f32
    %66 = vector.broadcast %cst_40 : f32 to vector<16x1xf32>
    %67 = arith.addf %65, %66 : vector<16x1xf32>
    %68 = math.rsqrt %67 : vector<16x1xf32>
    %69 = vector.broadcast %68 : vector<16x1xf32> to vector<16x32xf32>
    %70 = arith.mulf %60, %69 : vector<16x32xf32>
    %71 = vector.broadcast %53 : vector<1x32xf32> to vector<16x32xf32>
    %72 = arith.mulf %70, %71 : vector<16x32xf32>
    %73 = vector.broadcast %54 : vector<1x32xf32> to vector<16x32xf32>
    %74 = arith.addf %72, %73 : vector<16x32xf32>
    %75 = arith.addf %74, %5 : vector<16x32xf32>
    %76 = arith.truncf %75 : vector<16x32xf32> to vector<16x32xbf16>
    %c0_41 = arith.constant 0 : index
    %c0_42 = arith.constant 0 : index
    %77 = vector.load %arg14[%c0_41, %c0_42] : memref<32x64xbf16, #tpu.memory_space<vmem>>, vector<32x64xbf16>
    %cst_43 = arith.constant dense<0.000000e+00> : vector<16x64xf32>
    %78 = tpu.matmul %76, %77, %cst_43 {dimension_numbers = #tpu.dot_dimension_numbers<[1], [0], [0], [1], [0, 0, 1, 1], [], []>} : vector<16x32xbf16>, vector<32x64xbf16>, vector<16x64xf32> -> vector<16x64xf32>
    %c0_44 = arith.constant 0 : index
    %c0_45 = arith.constant 0 : index
    %79 = vector.load %arg15[%c0_44, %c0_45] : memref<1x64xf32, #tpu.memory_space<vmem>>, vector<1x64xf32>
    %80 = vector.broadcast %79 : vector<1x64xf32> to vector<16x64xf32>
    %81 = arith.addf %78, %80 : vector<16x64xf32>
    %cst_46 = arith.constant 5.000000e-01 : f32
    %82 = vector.broadcast %cst_46 : f32 to vector<16x64xf32>
    %83 = arith.mulf %81, %82 : vector<16x64xf32>
    %cst_47 = arith.constant 0.707106769 : f32
    %84 = vector.broadcast %cst_47 : f32 to vector<16x64xf32>
    %85 = arith.mulf %81, %84 : vector<16x64xf32>
    %86 = math.erf %85 : vector<16x64xf32>
    %cst_48 = arith.constant 1.000000e+00 : f32
    %87 = vector.broadcast %cst_48 : f32 to vector<16x64xf32>
    %88 = arith.addf %87, %86 : vector<16x64xf32>
    %89 = arith.mulf %83, %88 : vector<16x64xf32>
    %90 = arith.truncf %89 : vector<16x64xf32> to vector<16x64xbf16>
    %c0_49 = arith.constant 0 : index
    %c0_50 = arith.constant 0 : index
    %91 = vector.load %arg16[%c0_49, %c0_50] : memref<64x32xbf16, #tpu.memory_space<vmem>>, vector<64x32xbf16>
    %cst_51 = arith.constant dense<0.000000e+00> : vector<16x32xf32>
    %92 = tpu.matmul %90, %91, %cst_51 {dimension_numbers = #tpu.dot_dimension_numbers<[1], [0], [0], [1], [0, 0, 1, 1], [], []>} : vector<16x64xbf16>, vector<64x32xbf16>, vector<16x32xf32> -> vector<16x32xf32>
    %c0_52 = arith.constant 0 : index
    %c0_53 = arith.constant 0 : index
    %93 = vector.load %arg17[%c0_52, %c0_53] : memref<1x32xf32, #tpu.memory_space<vmem>>, vector<1x32xf32>
    %94 = vector.broadcast %93 : vector<1x32xf32> to vector<16x32xf32>
    %95 = arith.addf %92, %94 : vector<16x32xf32>
    %96 = arith.addf %95, %74 : vector<16x32xf32>
    %c0_54 = arith.constant 0 : index
    %c0_55 = arith.constant 0 : index
    %97 = vector.load %arg18[%c0_54, %c0_55] : memref<1x32xf32, #tpu.memory_space<vmem>>, vector<1x32xf32>
    %c0_56 = arith.constant 0 : index
    %c0_57 = arith.constant 0 : index
    %98 = vector.load %arg19[%c0_56, %c0_57] : memref<1x32xf32, #tpu.memory_space<vmem>>, vector<1x32xf32>
    %cst_58 = arith.constant dense<0.000000e+00> : vector<16xf32>
    %99 = vector.multi_reduction <add>, %96, %cst_58 [1] : vector<16x32xf32> to vector<16xf32>
    %100 = vector.shape_cast %99 : vector<16xf32> to vector<16x1xf32>
    %cst_59 = arith.constant 3.200000e+01 : f32
    %101 = vector.broadcast %cst_59 : f32 to vector<16x1xf32>
    %102 = arith.divf %100, %101 : vector<16x1xf32>
    %103 = vector.broadcast %102 : vector<16x1xf32> to vector<16x32xf32>
    %104 = arith.subf %96, %103 : vector<16x32xf32>
    %105 = arith.mulf %104, %104 : vector<16x32xf32>
    %cst_60 = arith.constant dense<0.000000e+00> : vector<16xf32>
    %106 = vector.multi_reduction <add>, %105, %cst_60 [1] : vector<16x32xf32> to vector<16xf32>
    %107 = vector.shape_cast %106 : vector<16xf32> to vector<16x1xf32>
    %cst_61 = arith.constant 3.200000e+01 : f32
    %108 = vector.broadcast %cst_61 : f32 to vector<16x1xf32>
    %109 = arith.divf %107, %108 : vector<16x1xf32>
    %cst_62 = arith.constant 9.99999996E-13 : f32
    %110 = vector.broadcast %cst_62 : f32 to vector<16x1xf32>
    %111 = arith.addf %109, %110 : vector<16x1xf32>
    %112 = math.rsqrt %111 : vector<16x1xf32>
    %113 = vector.broadcast %112 : vector<16x1xf32> to vector<16x32xf32>
    %114 = arith.mulf %104, %113 : vector<16x32xf32>
    %115 = vector.broadcast %97 : vector<1x32xf32> to vector<16x32xf32>
    %116 = arith.mulf %114, %115 : vector<16x32xf32>
    %117 = vector.broadcast %98 : vector<1x32xf32> to vector<16x32xf32>
    %118 = arith.addf %116, %117 : vector<16x32xf32>
    %119 = vector.shape_cast %118 : vector<16x32xf32> to vector<2x8x32xf32>
    %c0_63 = arith.constant 0 : index
    %c0_64 = arith.constant 0 : index
    %c0_65 = arith.constant 0 : index
    %120 = vector.load %arg20[%c0_63, %c0_64, %c0_65] : memref<2x8x32xf32, #tpu.memory_space<vmem>>, vector<2x8x32xf32>
    tpu.vector_store %arg20[%c0_63, %c0_64, %c0_65], %119 {strides = array<i32>} : memref<2x8x32xf32, #tpu.memory_space<vmem>>, vector<2x8x32xf32>,
    return
  }
  func.func @transform_0(%arg0: i32) -> (i32, i32, i32) {
    %c0_i32 = arith.constant 0 : i32
    %c0_i32_0 = arith.constant 0 : i32
    %c0_i32_1 = arith.constant 0 : i32
    return %arg0, %c0_i32, %c0_i32_0 : i32, i32, i32
  }
  func.func @transform_1(%arg0: i32) -> (i32, i32, i32) {
    %c0_i32 = arith.constant 0 : i32
    %c0_i32_0 = arith.constant 0 : i32
    %c0_i32_1 = arith.constant 0 : i32
    return %arg0, %c0_i32, %c0_i32_0 : i32, i32, i32
  }
  func.func @transform_2(%arg0: i32) -> (i32, i32, i32) {
    %c0_i32 = arith.constant 0 : i32
    %c0_i32_0 = arith.constant 0 : i32
    %c0_i32_1 = arith.constant 0 : i32
    return %arg0, %c0_i32, %c0_i32_0 : i32, i32, i32
  }
  func.func @transform_3(%arg0: i32) -> (i32, i32) {
    %c0_i32 = arith.constant 0 : i32
    %c0_i32_0 = arith.constant 0 : i32
    %c0_i32_1 = arith.constant 0 : i32
    return %c0_i32, %c0_i32_0 : i32, i32
  }
  func.func @transform_4(%arg0: i32) -> (i32, i32) {
    %c0_i32 = arith.constant 0 : i32
    %c0_i32_0 = arith.constant 0 : i32
    %c0_i32_1 = arith.constant 0 : i32
    return %c0_i32, %c0_i32_0 : i32, i32
  }
  func.func @transform_5(%arg0: i32) -> (i32, i32) {
    %c0_i32 = arith.constant 0 : i32
    %c0_i32_0 = arith.constant 0 : i32
    %c0_i32_1 = arith.constant 0 : i32
    return %c0_i32, %c0_i32_0 : i32, i32
  }
  func.func @transform_6(%arg0: i32) -> (i32, i32) {
    %c0_i32 = arith.constant 0 : i32
    %c0_i32_0 = arith.constant 0 : i32
    %c0_i32_1 = arith.constant 0 : i32
    return %c0_i32, %c0_i32_0 : i32, i32
  }
  func.func @transform_7(%arg0: i32) -> (i32, i32) {
    %c0_i32 = arith.constant 0 : i32
    %c0_i32_0 = arith.constant 0 : i32
    %c0_i32_1 = arith.constant 0 : i32
    return %c0_i32, %c0_i32_0 : i32, i32
  }
  func.func @transform_8(%arg0: i32) -> (i32, i32) {
    %c0_i32 = arith.constant 0 : i32
    %c0_i32_0 = arith.constant 0 : i32
    %c0_i32_1 = arith.constant 0 : i32
    return %c0_i32, %c0_i32_0 : i32, i32
  }
  func.func @transform_9(%arg0: i32) -> (i32, i32) {
    %c0_i32 = arith.constant 0 : i32
    %c0_i32_0 = arith.constant 0 : i32
    %c0_i32_1 = arith.constant 0 : i32
    return %c0_i32, %c0_i32_0 : i32, i32
  }
  func.func @transform_10(%arg0: i32) -> (i32, i32) {
    %c0_i32 = arith.constant 0 : i32
    %c0_i32_0 = arith.constant 0 : i32
    %c0_i32_1 = arith.constant 0 : i32
    return %c0_i32, %c0_i32_0 : i32, i32
  }
  func.func @transform_11(%arg0: i32) -> (i32, i32) {
    %c0_i32 = arith.constant 0 : i32
    %c0_i32_0 = arith.constant 0 : i32
    %c0_i32_1 = arith.constant 0 : i32
    return %c0_i32, %c0_i32_0 : i32, i32
  }
  func.func @transform_12(%arg0: i32) -> (i32, i32) {
    %c0_i32 = arith.constant 0 : i32
    %c0_i32_0 = arith.constant 0 : i32
    %c0_i32_1 = arith.constant 0 : i32
    return %c0_i32, %c0_i32_0 : i32, i32
  }
  func.func @transform_13(%arg0: i32) -> (i32, i32) {
    %c0_i32 = arith.constant 0 : i32
    %c0_i32_0 = arith.constant 0 : i32
    %c0_i32_1 = arith.constant 0 : i32
    return %c0_i32, %c0_i32_0 : i32, i32
  }
  func.func @transform_14(%arg0: i32) -> (i32, i32) {
    %c0_i32 = arith.constant 0 : i32
    %c0_i32_0 = arith.constant 0 : i32
    %c0_i32_1 = arith.constant 0 : i32
    return %c0_i32, %c0_i32_0 : i32, i32
  }
  func.func @transform_15(%arg0: i32) -> (i32, i32) {
    %c0_i32 = arith.constant 0 : i32
    %c0_i32_0 = arith.constant 0 : i32
    %c0_i32_1 = arith.constant 0 : i32
    return %c0_i32, %c0_i32_0 : i32, i32
  }
  func.func @transform_16(%arg0: i32) -> (i32, i32) {
    %c0_i32 = arith.constant 0 : i32
    %c0_i32_0 = arith.constant 0 : i32
    %c0_i32_1 = arith.constant 0 : i32
    return %c0_i32, %c0_i32_0 : i32, i32
  }
  func.func @transform_17(%arg0: i32) -> (i32, i32) {
    %c0_i32 = arith.constant 0 : i32
    %c0_i32_0 = arith.constant 0 : i32
    %c0_i32_1 = arith.constant 0 : i32
    return %c0_i32, %c0_i32_0 : i32, i32
  }
  func.func @transform_18(%arg0: i32) -> (i32, i32) {
    %c0_i32 = arith.constant 0 : i32
    %c0_i32_0 = arith.constant 0 : i32
    %c0_i32_1 = arith.constant 0 : i32
    return %c0_i32, %c0_i32_0 : i32, i32
  }
  func.func @transform_19(%arg0: i32) -> (i32, i32, i32) {
    %c0_i32 = arith.constant 0 : i32
    %c0_i32_0 = arith.constant 0 : i32
    %c0_i32_1 = arith.constant 0 : i32
    return %arg0, %c0_i32, %c0_i32_0 : i32, i32, i32
  }
}

module attributes {stable_mosaic.version = 11 : i64} {
  func.func @cross_layer_kernel(%arg0: i32, %arg1: memref<2x8x32xf32, #tpu.memory_space<vmem>>, %arg2: memref<2x8x32xf32, #tpu.memory_space<vmem>>, %arg3: memref<2x8x32xf32, #tpu.memory_space<vmem>>, %arg4: memref<32x32xbf16, #tpu.memory_space<vmem>>, %arg5: memref<1x32xf32, #tpu.memory_space<vmem>>, %arg6: memref<32x32xbf16, #tpu.memory_space<vmem>>, %arg7: memref<1x32xf32, #tpu.memory_space<vmem>>, %arg8: memref<32x32xbf16, #tpu.memory_space<vmem>>, %arg9: memref<1x32xf32, #tpu.memory_space<vmem>>, %arg10: memref<32x32xbf16, #tpu.memory_space<vmem>>, %arg11: memref<1x32xf32, #tpu.memory_space<vmem>>, %arg12: memref<1x32xf32, #tpu.memory_space<vmem>>, %arg13: memref<1x32xf32, #tpu.memory_space<vmem>>, %arg14: memref<32x64xbf16, #tpu.memory_space<vmem>>, %arg15: memref<1x64xf32, #tpu.memory_space<vmem>>, %arg16: memref<64x32xbf16, #tpu.memory_space<vmem>>, %arg17: memref<1x32xf32, #tpu.memory_space<vmem>>, %arg18: memref<1x32xf32, #tpu.memory_space<vmem>>, %arg19: memref<1x32xf32, #tpu.memory_space<vmem>>, %arg20: memref<2x8x32xf32, #tpu.memory_space<vmem>>) attributes {dimension_semantics = [#tpu.dimension_semantics<parallel>], iteration_bounds = array<i64: 1>, scalar_prefetch = 0 : i64, scratch_operands = 0 : i64, tpu.core_type = #tpu.core_type<tc>, window_params = [{transform_indices = @transform_0, window_bounds = array<i64: 2, 8, 32>}, {transform_indices = @transform_1, window_bounds = array<i64: 2, 8, 32>}, {transform_indices = @transform_2, window_bounds = array<i64: 2, 8, 32>}, {pipeline_mode = #tpu.pipeline_mode<synchronous>, transform_indices = @transform_3, window_bounds = array<i64: 32, 32>}, {pipeline_mode = #tpu.pipeline_mode<synchronous>, transform_indices = @transform_4, window_bounds = array<i64: 1, 32>}, {pipeline_mode = #tpu.pipeline_mode<synchronous>, transform_indices = @transform_5, window_bounds = array<i64: 32, 32>}, {pipeline_mode = #tpu.pipeline_mode<synchronous>, transform_indices = @transform_6, window_bounds = array<i64: 1, 32>}, {pipeline_mode = #tpu.pipeline_mode<synchronous>, transform_indices = @transform_7, window_bounds = array<i64: 32, 32>}, {pipeline_mode = #tpu.pipeline_mode<synchronous>, transform_indices = @transform_8, window_bounds = array<i64: 1, 32>}, {pipeline_mode = #tpu.pipeline_mode<synchronous>, transform_indices = @transform_9, window_bounds = array<i64: 32, 32>}, {pipeline_mode = #tpu.pipeline_mode<synchronous>, transform_indices = @transform_10, window_bounds = array<i64: 1, 32>}, {pipeline_mode = #tpu.pipeline_mode<synchronous>, transform_indices = @transform_11, window_bounds = array<i64: 1, 32>}, {pipeline_mode = #tpu.pipeline_mode<synchronous>, transform_indices = @transform_12, window_bounds = array<i64: 1, 32>}, {pipeline_mode = #tpu.pipeline_mode<synchronous>, transform_indices = @transform_13, window_bounds = array<i64: 32, 64>}, {pipeline_mode = #tpu.pipeline_mode<synchronous>, transform_indices = @transform_14, window_bounds = array<i64: 1, 64>}, {pipeline_mode = #tpu.pipeline_mode<synchronous>, transform_indices = @transform_15, window_bounds = array<i64: 64, 32>}, {pipeline_mode = #tpu.pipeline_mode<synchronous>, transform_indices = @transform_16, window_bounds = array<i64: 1, 32>}, {pipeline_mode = #tpu.pipeline_mode<synchronous>, transform_indices = @transform_17, window_bounds = array<i64: 1, 32>}, {pipeline_mode = #tpu.pipeline_mode<synchronous>, transform_indices = @transform_18, window_bounds = array<i64: 1, 32>}, {transform_indices = @transform_19, window_bounds = array<i64: 2, 8, 32>}]} {
    %c0 = arith.constant 0 : index
    %c0_0 = arith.constant 0 : index
    %c0_1 = arith.constant 0 : index
    %0 = vector.load %arg2[%c0, %c0_0, %c0_1] : memref<2x8x32xf32, #tpu.memory_space<vmem>>, vector<2x8x32xf32>
    %c0_2 = arith.constant 0 : index
    %c0_3 = arith.constant 0 : index
    %c0_4 = arith.constant 0 : index
    %1 = vector.load %arg1[%c0_2, %c0_3, %c0_4] : memref<2x8x32xf32, #tpu.memory_space<vmem>>, vector<2x8x32xf32>
    %c0_5 = arith.constant 0 : index
    %c0_6 = arith.constant 0 : index
    %c0_7 = arith.constant 0 : index
    %2 = vector.load %arg3[%c0_5, %c0_6, %c0_7] : memref<2x8x32xf32, #tpu.memory_space<vmem>>, vector<2x8x32xf32>
    %3 = vector.shape_cast %0 : vector<2x8x32xf32> to vector<16x32xf32>
    %4 = vector.shape_cast %1 : vector<2x8x32xf32> to vector<16x32xf32>
    %5 = vector.shape_cast %2 : vector<2x8x32xf32> to vector<16x32xf32>
    %6 = arith.truncf %3 : vector<16x32xf32> to vector<16x32xbf16>
    %c0_8 = arith.constant 0 : index
    %c0_9 = arith.constant 0 : index
    %7 = vector.load %arg4[%c0_8, %c0_9] : memref<32x32xbf16, #tpu.memory_space<vmem>>, vector<32x32xbf16>
    %cst = arith.constant dense<0.000000e+00> : vector<16x32xf32>
    %8 = tpu.matmul %6, %7, %cst {dimension_numbers = #tpu.dot_dimension_numbers<[1], [0], [0], [1], [0, 0, 1, 1], [], []>} : vector<16x32xbf16>, vector<32x32xbf16>, vector<16x32xf32> -> vector<16x32xf32>
    %c0_10 = arith.constant 0 : index
    %c0_11 = arith.constant 0 : index
    %9 = vector.load %arg5[%c0_10, %c0_11] : memref<1x32xf32, #tpu.memory_space<vmem>>, vector<1x32xf32>
    %10 = vector.broadcast %9 : vector<1x32xf32> to vector<16x32xf32>
    %11 = arith.addf %8, %10 : vector<16x32xf32>
    %12 = arith.truncf %4 : vector<16x32xf32> to vector<16x32xbf16>
    %c0_12 = arith.constant 0 : index
    %c0_13 = arith.constant 0 : index
    %13 = vector.load %arg6[%c0_12, %c0_13] : memref<32x32xbf16, #tpu.memory_space<vmem>>, vector<32x32xbf16>
    %cst_14 = arith.constant dense<0.000000e+00> : vector<16x32xf32>
    %14 = tpu.matmul %12, %13, %cst_14 {dimension_numbers = #tpu.dot_dimension_numbers<[1], [0], [0], [1], [0, 0, 1, 1], [], []>} : vector<16x32xbf16>, vector<32x32xbf16>, vector<16x32xf32> -> vector<16x32xf32>
    %c0_15 = arith.constant 0 : index
    %c0_16 = arith.constant 0 : index
    %15 = vector.load %arg7[%c0_15, %c0_16] : memref<1x32xf32, #tpu.memory_space<vmem>>, vector<1x32xf32>
    %16 = vector.broadcast %15 : vector<1x32xf32> to vector<16x32xf32>
    %17 = arith.addf %14, %16 : vector<16x32xf32>
    %18 = arith.truncf %4 : vector<16x32xf32> to vector<16x32xbf16>
    %c0_17 = arith.constant 0 : index
    %c0_18 = arith.constant 0 : index
    %19 = vector.load %arg8[%c0_17, %c0_18] : memref<32x32xbf16, #tpu.memory_space<vmem>>, vector<32x32xbf16>
    %cst_19 = arith.constant dense<0.000000e+00> : vector<16x32xf32>
    %20 = tpu.matmul %18, %19, %cst_19 {dimension_numbers = #tpu.dot_dimension_numbers<[1], [0], [0], [1], [0, 0, 1, 1], [], []>} : vector<16x32xbf16>, vector<32x32xbf16>, vector<16x32xf32> -> vector<16x32xf32>
    %c0_20 = arith.constant 0 : index
    %c0_21 = arith.constant 0 : index
    %21 = vector.load %arg9[%c0_20, %c0_21] : memref<1x32xf32, #tpu.memory_space<vmem>>, vector<1x32xf32>
    %22 = vector.broadcast %21 : vector<1x32xf32> to vector<16x32xf32>
    %23 = arith.addf %20, %22 : vector<16x32xf32>
    %cst_22 = arith.constant 0.176776692 : f32
    %24 = vector.broadcast %cst_22 : f32 to vector<16x32xf32>
    %25 = arith.mulf %11, %24 : vector<16x32xf32>
    %26 = vector.shape_cast %25 : vector<16x32xf32> to vector<2x8x32xf32>
    %27 = arith.truncf %26 : vector<2x8x32xf32> to vector<2x8x32xbf16>
    %28 = vector.shape_cast %17 : vector<16x32xf32> to vector<2x8x32xf32>
    %29 = arith.truncf %28 : vector<2x8x32xf32> to vector<2x8x32xbf16>
    %30 = vector.shape_cast %23 : vector<16x32xf32> to vector<2x8x32xf32>
    %31 = arith.truncf %30 : vector<2x8x32xf32> to vector<2x8x32xbf16>
    "tpu.trace_start"() <{level = 10 : i32, message = "bqh,bkh->bqk"}> : () -> ()
    %cst_23 = arith.constant dense<0.000000e+00> : vector<2x8x8xf32>
    %32 = tpu.matmul %27, %29, %cst_23 {dimension_numbers = #tpu.dot_dimension_numbers<[2], [2], [1], [1], [0, 0, 0, 1, 1, 1], [0], [0]>} : vector<2x8x32xbf16>, vector<2x8x32xbf16>, vector<2x8x8xf32> -> vector<2x8x8xf32>
    "tpu.trace_stop"() : () -> ()
    %cst_24 = arith.constant dense<0xFF800000> : vector<2x8xf32>
    %33 = vector.multi_reduction <maximumf>, %32, %cst_24 [2] : vector<2x8x8xf32> to vector<2x8xf32>
    %34 = vector.shape_cast %33 : vector<2x8xf32> to vector<2x8x1xf32>
    %35 = vector.broadcast %34 : vector<2x8x1xf32> to vector<2x8x8xf32>
    %36 = arith.subf %32, %35 : vector<2x8x8xf32>
    %37 = math.exp %36 : vector<2x8x8xf32>
    %cst_25 = arith.constant dense<0.000000e+00> : vector<2x8xf32>
    %38 = vector.multi_reduction <add>, %37, %cst_25 [2] : vector<2x8x8xf32> to vector<2x8xf32>
    %39 = vector.shape_cast %38 : vector<2x8xf32> to vector<2x8x1xf32>
    %40 = tpu.reciprocal %39 {approx = true} : vector<2x8x1xf32> -> vector<2x8x1xf32>
    %41 = vector.broadcast %40 : vector<2x8x1xf32> to vector<2x8x8xf32>
    %42 = arith.mulf %37, %41 : vector<2x8x8xf32>
    %43 = arith.truncf %42 : vector<2x8x8xf32> to vector<2x8x8xbf16>
    "tpu.trace_start"() <{level = 10 : i32, message = "bqk,bkh->bqh"}> : () -> ()
    %cst_26 = arith.constant dense<0.000000e+00> : vector<2x8x32xf32>
    %44 = tpu.matmul %43, %31, %cst_26 {dimension_numbers = #tpu.dot_dimension_numbers<[2], [1], [1], [2], [0, 0, 0, 1, 1, 2], [0], [0]>} : vector<2x8x8xbf16>, vector<2x8x32xbf16>, vector<2x8x32xf32> -> vector<2x8x32xf32>
    "tpu.trace_stop"() : () -> ()
    %45 = vector.shape_cast %44 : vector<2x8x32xf32> to vector<16x32xf32>
    %46 = arith.truncf %45 : vector<16x32xf32> to vector<16x32xbf16>
    %c0_27 = arith.constant 0 : index
    %c0_28 = arith.constant 0 : index
    %47 = vector.load %arg10[%c0_27, %c0_28] : memref<32x32xbf16, #tpu.memory_space<vmem>>, vector<32x32xbf16>
    %cst_29 = arith.constant dense<0.000000e+00> : vector<16x32xf32>
    %48 = tpu.matmul %46, %47, %cst_29 {dimension_numbers = #tpu.dot_dimension_numbers<[1], [0], [0], [1], [0, 0, 1, 1], [], []>} : vector<16x32xbf16>, vector<32x32xbf16>, vector<16x32xf32> -> vector<16x32xf32>
    %c0_30 = arith.constant 0 : index
    %c0_31 = arith.constant 0 : index
    %49 = vector.load %arg11[%c0_30, %c0_31] : memref<1x32xf32, #tpu.memory_space<vmem>>, vector<1x32xf32>
    %50 = vector.broadcast %49 : vector<1x32xf32> to vector<16x32xf32>
    %51 = arith.addf %48, %50 : vector<16x32xf32>
    %52 = arith.addf %51, %3 : vector<16x32xf32>
    %c0_32 = arith.constant 0 : index
    %c0_33 = arith.constant 0 : index
    %53 = vector.load %arg12[%c0_32, %c0_33] : memref<1x32xf32, #tpu.memory_space<vmem>>, vector<1x32xf32>
    %c0_34 = arith.constant 0 : index
    %c0_35 = arith.constant 0 : index
    %54 = vector.load %arg13[%c0_34, %c0_35] : memref<1x32xf32, #tpu.memory_space<vmem>>, vector<1x32xf32>
    %cst_36 = arith.constant dense<0.000000e+00> : vector<16xf32>
    %55 = vector.multi_reduction <add>, %52, %cst_36 [1] : vector<16x32xf32> to vector<16xf32>
    %56 = vector.shape_cast %55 : vector<16xf32> to vector<16x1xf32>
    %cst_37 = arith.constant 3.200000e+01 : f32
    %57 = vector.broadcast %cst_37 : f32 to vector<16x1xf32>
    %58 = arith.divf %56, %57 : vector<16x1xf32>
    %59 = vector.broadcast %58 : vector<16x1xf32> to vector<16x32xf32>
    %60 = arith.subf %52, %59 : vector<16x32xf32>
    %61 = arith.mulf %60, %60 : vector<16x32xf32>
    %cst_38 = arith.constant dense<0.000000e+00> : vector<16xf32>
    %62 = vector.multi_reduction <add>, %61, %cst_38 [1] : vector<16x32xf32> to vector<16xf32>
    %63 = vector.shape_cast %62 : vector<16xf32> to vector<16x1xf32>
    %cst_39 = arith.constant 3.200000e+01 : f32
    %64 = vector.broadcast %cst_39 : f32 to vector<16x1xf32>
    %65 = arith.divf %63, %64 : vector<16x1xf32>
    %cst_40 = arith.constant 9.99999996E-13 : f32
    %66 = vector.broadcast %cst_40 : f32 to vector<16x1xf32>
    %67 = arith.addf %65, %66 : vector<16x1xf32>
    %68 = math.rsqrt %67 : vector<16x1xf32>
    %69 = vector.broadcast %68 : vector<16x1xf32> to vector<16x32xf32>
    %70 = arith.mulf %60, %69 : vector<16x32xf32>
    %71 = vector.broadcast %53 : vector<1x32xf32> to vector<16x32xf32>
    %72 = arith.mulf %70, %71 : vector<16x32xf32>
    %73 = vector.broadcast %54 : vector<1x32xf32> to vector<16x32xf32>
    %74 = arith.addf %72, %73 : vector<16x32xf32>
    %75 = arith.addf %74, %5 : vector<16x32xf32>
    %76 = arith.truncf %75 : vector<16x32xf32> to vector<16x32xbf16>
    %c0_41 = arith.constant 0 : index
    %c0_42 = arith.constant 0 : index
    %77 = vector.load %arg14[%c0_41, %c0_42] : memref<32x64xbf16, #tpu.memory_space<vmem>>, vector<32x64xbf16>
    %cst_43 = arith.constant dense<0.000000e+00> : vector<16x64xf32>
    %78 = tpu.matmul %76, %77, %cst_43 {dimension_numbers = #tpu.dot_dimension_numbers<[1], [0], [0], [1], [0, 0, 1, 1], [], []>} : vector<16x32xbf16>, vector<32x64xbf16>, vector<16x64xf32> -> vector<16x64xf32>
    %c0_44 = arith.constant 0 : index
    %c0_45 = arith.constant 0 : index
    %79 = vector.load %arg15[%c0_44, %c0_45] : memref<1x64xf32, #tpu.memory_space<vmem>>, vector<1x64xf32>
    %80 = vector.broadcast %79 : vector<1x64xf32> to vector<16x64xf32>
    %81 = arith.addf %78, %80 : vector<16x64xf32>
    %cst_46 = arith.constant 5.000000e-01 : f32
    %82 = vector.broadcast %cst_46 : f32 to vector<16x64xf32>
    %83 = arith.mulf %81, %82 : vector<16x64xf32>
    %cst_47 = arith.constant 0.707106769 : f32
    %84 = vector.broadcast %cst_47 : f32 to vector<16x64xf32>
    %85 = arith.mulf %81, %84 : vector<16x64xf32>
    %86 = math.erf %85 : vector<16x64xf32>
    %cst_48 = arith.constant 1.000000e+00 : f32
    %87 = vector.broadcast %cst_48 : f32 to vector<16x64xf32>
    %88 = arith.addf %87, %86 : vector<16x64xf32>
    %89 = arith.mulf %83, %88 : vector<16x64xf32>
    %90 = arith.truncf %89 : vector<16x64xf32> to vector<16x64xbf16>
    %c0_49 = arith.constant 0 : index
    %c0_50 = arith.constant 0 : index
    %91 = vector.load %arg16[%c0_49, %c0_50] : memref<64x32xbf16, #tpu.memory_space<vmem>>, vector<64x32xbf16>
    %cst_51 = arith.constant dense<0.000000e+00> : vector<16x32xf32>
    %92 = tpu.matmul %90, %91, %cst_51 {dimension_numbers = #tpu.dot_dimension_numbers<[1], [0], [0], [1], [0, 0, 1, 1], [], []>} : vector<16x64xbf16>, vector<64x32xbf16>, vector<16x32xf32> -> vector<16x32xf32>
    %c0_52 = arith.constant 0 : index
    %c0_53 = arith.constant 0 : index
    %93 = vector.load %arg17[%c0_52, %c0_53] : memref<1x32xf32, #tpu.memory_space<vmem>>, vector<1x32xf32>
    %94 = vector.broadcast %93 : vector<1x32xf32> to vector<16x32xf32>
    %95 = arith.addf %92, %94 : vector<16x32xf32>
    %96 = arith.addf %95, %74 : vector<16x32xf32>
    %c0_54 = arith.constant 0 : index
    %c0_55 = arith.constant 0 : index
    %97 = vector.load %arg18[%c0_54, %c0_55] : memref<1x32xf32, #tpu.memory_space<vmem>>, vector<1x32xf32>
    %c0_56 = arith.constant 0 : index
    %c0_57 = arith.constant 0 : index
    %98 = vector.load %arg19[%c0_56, %c0_57] : memref<1x32xf32, #tpu.memory_space<vmem>>, vector<1x32xf32>
    %cst_58 = arith.constant dense<0.000000e+00> : vector<16xf32>
    %99 = vector.multi_reduction <add>, %96, %cst_58 [1] : vector<16x32xf32> to vector<16xf32>
    %100 = vector.shape_cast %99 : vector<16xf32> to vector<16x1xf32>
    %cst_59 = arith.constant 3.200000e+01 : f32
    %101 = vector.broadcast %cst_59 : f32 to vector<16x1xf32>
    %102 = arith.divf %100, %101 : vector<16x1xf32>
    %103 = vector.broadcast %102 : vector<16x1xf32> to vector<16x32xf32>
    %104 = arith.subf %96, %103 : vector<16x32xf32>
    %105 = arith.mulf %104, %104 : vector<16x32xf32>
    %cst_60 = arith.constant dense<0.000000e+00> : vector<16xf32>
    %106 = vector.multi_reduction <add>, %105, %cst_60 [1] : vector<16x32xf32> to vector<16xf32>
    %107 = vector.shape_cast %106 : vector<16xf32> to vector<16x1xf32>
    %cst_61 = arith.constant 3.200000e+01 : f32
    %108 = vector.broadcast %cst_61 : f32 to vector<16x1xf32>
    %109 = arith.divf %107, %108 : vector<16x1xf32>
    %cst_62 = arith.constant 9.99999996E-13 : f32
    %110 = vector.broadcast %cst_62 : f32 to vector<16x1xf32>
    %111 = arith.addf %109, %110 : vector<16x1xf32>
    %112 = math.rsqrt %111 : vector<16x1xf32>
    %113 = vector.broadcast %112 : vector<16x1xf32> to vector<16x32xf32>
    %114 = arith.mulf %104, %113 : vector<16x32xf32>
    %115 = vector.broadcast %97 : vector<1x32xf32> to vector<16x32xf32>
    %116 = arith.mulf %114, %115 : vector<16x32xf32>
    %117 = vector.broadcast %98 : vector<1x32xf32> to vector<16x32xf32>
    %118 = arith.addf %116, %117 : vector<16x32xf32>
    %119 = vector.shape_cast %118 : vector<16x32xf32> to vector<2x8x32xf32>
    %c0_63 = arith.constant 0 : index
    %c0_64 = arith.constant 0 : index
    %c0_65 = arith.constant 0 : index
    %120 = vector.load %arg20[%c0_63, %c0_64, %c0_65] : memref<2x8x32xf32, #tpu.memory_space<vmem>>, vector<2x8x32xf32>
    tpu.vector_store %arg20[%c0_63, %c0_64, %c0_65], %119 {strides = array<i32>} : memref<2x8x32xf32, #tpu.memory_space<vmem>>, vector<2x8x32xf32>,
    return
  }
  func.func @transform_0(%arg0: i32) -> (i32, i32, i32) {
    %c0_i32 = arith.constant 0 : i32
    %c0_i32_0 = arith.constant 0 : i32
    %c0_i32_1 = arith.constant 0 : i32
    return %arg0, %c0_i32, %c0_i32_0 : i32, i32, i32
  }
  func.func @transform_1(%arg0: i32) -> (i32, i32, i32) {
    %c0_i32 = arith.constant 0 : i32
    %c0_i32_0 = arith.constant 0 : i32
    %c0_i32_1 = arith.constant 0 : i32
    return %arg0, %c0_i32, %c0_i32_0 : i32, i32, i32
  }
  func.func @transform_2(%arg0: i32) -> (i32, i32, i32) {
    %c0_i32 = arith.constant 0 : i32
    %c0_i32_0 = arith.constant 0 : i32
    %c0_i32_1 = arith.constant 0 : i32
    return %arg0, %c0_i32, %c0_i32_0 : i32, i32, i32
  }
  func.func @transform_3(%arg0: i32) -> (i32, i32) {
    %c0_i32 = arith.constant 0 : i32
    %c0_i32_0 = arith.constant 0 : i32
    %c0_i32_1 = arith.constant 0 : i32
    return %c0_i32, %c0_i32_0 : i32, i32
  }
  func.func @transform_4(%arg0: i32) -> (i32, i32) {
    %c0_i32 = arith.constant 0 : i32
    %c0_i32_0 = arith.constant 0 : i32
    %c0_i32_1 = arith.constant 0 : i32
    return %c0_i32, %c0_i32_0 : i32, i32
  }
  func.func @transform_5(%arg0: i32) -> (i32, i32) {
    %c0_i32 = arith.constant 0 : i32
    %c0_i32_0 = arith.constant 0 : i32
    %c0_i32_1 = arith.constant 0 : i32
    return %c0_i32, %c0_i32_0 : i32, i32
  }
  func.func @transform_6(%arg0: i32) -> (i32, i32) {
    %c0_i32 = arith.constant 0 : i32
    %c0_i32_0 = arith.constant 0 : i32
    %c0_i32_1 = arith.constant 0 : i32
    return %c0_i32, %c0_i32_0 : i32, i32
  }
  func.func @transform_7(%arg0: i32) -> (i32, i32) {
    %c0_i32 = arith.constant 0 : i32
    %c0_i32_0 = arith.constant 0 : i32
    %c0_i32_1 = arith.constant 0 : i32
    return %c0_i32, %c0_i32_0 : i32, i32
  }
  func.func @transform_8(%arg0: i32) -> (i32, i32) {
    %c0_i32 = arith.constant 0 : i32
    %c0_i32_0 = arith.constant 0 : i32
    %c0_i32_1 = arith.constant 0 : i32
    return %c0_i32, %c0_i32_0 : i32, i32
  }
  func.func @transform_9(%arg0: i32) -> (i32, i32) {
    %c0_i32 = arith.constant 0 : i32
    %c0_i32_0 = arith.constant 0 : i32
    %c0_i32_1 = arith.constant 0 : i32
    return %c0_i32, %c0_i32_0 : i32, i32
  }
  func.func @transform_10(%arg0: i32) -> (i32, i32) {
    %c0_i32 = arith.constant 0 : i32
    %c0_i32_0 = arith.constant 0 : i32
    %c0_i32_1 = arith.constant 0 : i32
    return %c0_i32, %c0_i32_0 : i32, i32
  }
  func.func @transform_11(%arg0: i32) -> (i32, i32) {
    %c0_i32 = arith.constant 0 : i32
    %c0_i32_0 = arith.constant 0 : i32
    %c0_i32_1 = arith.constant 0 : i32
    return %c0_i32, %c0_i32_0 : i32, i32
  }
  func.func @transform_12(%arg0: i32) -> (i32, i32) {
    %c0_i32 = arith.constant 0 : i32
    %c0_i32_0 = arith.constant 0 : i32
    %c0_i32_1 = arith.constant 0 : i32
    return %c0_i32, %c0_i32_0 : i32, i32
  }
  func.func @transform_13(%arg0: i32) -> (i32, i32) {
    %c0_i32 = arith.constant 0 : i32
    %c0_i32_0 = arith.constant 0 : i32
    %c0_i32_1 = arith.constant 0 : i32
    return %c0_i32, %c0_i32_0 : i32, i32
  }
  func.func @transform_14(%arg0: i32) -> (i32, i32) {
    %c0_i32 = arith.constant 0 : i32
    %c0_i32_0 = arith.constant 0 : i32
    %c0_i32_1 = arith.constant 0 : i32
    return %c0_i32, %c0_i32_0 : i32, i32
  }
  func.func @transform_15(%arg0: i32) -> (i32, i32) {
    %c0_i32 = arith.constant 0 : i32
    %c0_i32_0 = arith.constant 0 : i32
    %c0_i32_1 = arith.constant 0 : i32
    return %c0_i32, %c0_i32_0 : i32, i32
  }
  func.func @transform_16(%arg0: i32) -> (i32, i32) {
    %c0_i32 = arith.constant 0 : i32
    %c0_i32_0 = arith.constant 0 : i32
    %c0_i32_1 = arith.constant 0 : i32
    return %c0_i32, %c0_i32_0 : i32, i32
  }
  func.func @transform_17(%arg0: i32) -> (i32, i32) {
    %c0_i32 = arith.constant 0 : i32
    %c0_i32_0 = arith.constant 0 : i32
    %c0_i32_1 = arith.constant 0 : i32
    return %c0_i32, %c0_i32_0 : i32, i32
  }
  func.func @transform_18(%arg0: i32) -> (i32, i32) {
    %c0_i32 = arith.constant 0 : i32
    %c0_i32_0 = arith.constant 0 : i32
    %c0_i32_1 = arith.constant 0 : i32
    return %c0_i32, %c0_i32_0 : i32, i32
  }
  func.func @transform_19(%arg0: i32) -> (i32, i32, i32) {
    %c0_i32 = arith.constant 0 : i32
    %c0_i32_0 = arith.constant 0 : i32
    %c0_i32_1 = arith.constant 0 : i32
    return %arg0, %c0_i32, %c0_i32_0 : i32, i32, i32
  }
}

</mosaic_0001>

<bundles_post_ra>
// kernel: tpu_custom_call.1
= control target key start
LH: loop header
LB: loop body
LE: loop exit
PB: predicated region body
PF: predicated region fallthrough
CT: control target
= control target key end

     0   :  { %s1708_s0 = inlined_call_operand.vmem [shape: f32[2,8,32], index: 0, kind: input, shape index: {}]   ;;  %s1709_s1 = inlined_call_operand.vmem [shape: f32[2,8,32], index: 1, kind: input, shape index: {}]   ;;  %s1710_s2 = inlined_call_operand.vmem [shape: f32[2,8,32], index: 2, kind: input, shape index: {}]   ;;  %s1711_s3 = inlined_call_operand.hbm [shape: bf16[32,32], index: 3, kind: input, shape index: {}]   ;;  %s1712_s4 = inlined_call_operand.vmem [shape: f32[1,32], index: 4, kind: input, shape index: {}]   ;;  %s1713_s5 = inlined_call_operand.hbm [shape: bf16[32,32], index: 5, kind: input, shape index: {}]   ;;  %s1714_s6 = inlined_call_operand.hbm [shape: f32[1,32], index: 6, kind: input, shape index: {}]   ;;  %s1715_s7 = inlined_call_operand.hbm [shape: bf16[32,32], index: 7, kind: input, shape index: {}]   ;;  %s1716_s8 = inlined_call_operand.hbm [shape: f32[1,32], index: 8, kind: input, shape index: {}]   ;;  %s1717_s9 = inlined_call_operand.vmem [shape: bf16[32,32], index: 9, kind: input, shape index: {}]   ;;  %s1718_s10 = inlined_call_operand.hbm [shape: f32[1,32], index: 10, kind: input, shape index: {}]   ;;  %s1719_s11 = inlined_call_operand.hbm [shape: f32[1,32], index: 11, kind: input, shape index: {}]   ;;  %s1720_s12 = inlined_call_operand.hbm [shape: f32[1,32], index: 12, kind: input, shape index: {}]   ;;  %s1721_s13 = inlined_call_operand.vmem [shape: bf16[32,64], index: 13, kind: input, shape index: {}]   ;;  %s1722_s14 = inlined_call_operand.vmem [shape: f32[1,64], index: 14, kind: input, shape index: {}]   ;;  %s1723_s15 = inlined_call_operand.vmem [shape: bf16[64,32], index: 15, kind: input, shape index: {}]   ;;  %s1724_s16 = inlined_call_operand.vmem [shape: f32[1,32], index: 16, kind: input, shape index: {}]   ;;  %s1725_s17 = inlined_call_operand.vmem [shape: f32[1,32], index: 17, kind: input, shape index: {}]   ;;  %s1726_s18 = inlined_call_operand.vmem [shape: f32[1,32], index: 18, kind: input, shape index: {}]   ;;  %s1727_s19 = inlined_call_operand.hbm [shape: f32[2,8,32], index: 19, kind: output, shape index: {}]  }
   0x1   :  { %1732 = sst [smem:[#allocation23_spill]] %s1708_s0 }
   0x2   :  { %1733 = sst [smem:[#allocation24_spill]] %s1709_s1 }
   0x3   :  { %1734 = sst [smem:[#allocation25_spill]] %s1710_s2 }
   0x4   :  { %1735 = sst [smem:[#allocation26_spill]] %s1711_s3 }
   0x5   :  { %24 = vsyncpa [#allocation3], 0 }
   0x6   :  { %25 = vsyncpa [#allocation6], 0 }
   0x7   :  { %26 = vsyncpa [#allocation9], 0 }
   0x8   :  { %27 = vsyncpa [#allocation12], 0 }
   0x9   :  { %28 = vsyncpa [#allocation15], 0 }
   0xa   :  { %29 = vsyncpa [#allocation4], 0  ;;  %s1334_s0 = smov [#allocation5]   ;;  %s1335_s20 = smov [#allocation8]  }
   0xb   :  { %s55_s30 = sshll.u32 %s1334_s0, 4  ;;  %s77_s21 = sshll.u32 %s1335_s20, 4  ;;  %s56_s30 = int_to_ptr.vmem [resolvable:$true] %s55_s30  ;;  %s1449_s21 = int_to_ptr.vmem [resolvable:$true] %s77_s21 }
   0xc   :  { %s1124_s2 = scalar_lea.hbm %s1713_s5, 256 }
   0xd   :  { %p1125_p0 = scmp.ne.s32.totalorder %s1713_s5, %s1124_s2  ;;  %p1128_p1 = scmp.lt.u32.totalorder %s1124_s2, %s1713_s5 }
   0xf   :  { %p1130_p2 = pnand %p1128_p1, %p1125_p0 }
  0x11   :  { %1133 = shalt.err (!%p1130_p2)
}
  0x12   :  { %s1134_s26 = scalar_lea.vmem %s56_s30, 256  ;;  %p1139_p4 = scmp.lt.s32.totalorder %s56_s30, %s56_s30 }
  0x13   :  { %p1135_p3 = scmp.ne.s32.totalorder %s56_s30, %s1134_s26  ;;  %p1140_p5 = scmp.lt.s32.totalorder %s1134_s26, %s1134_s26 }
  0x15   :  { %p1141_p6 = por %p1140_p5, %p1139_p4 }
  0x17   :  { %p1142_p7 = pnand %p1141_p6, %p1135_p3 }
  0x19   :  { %1145 = shalt.err (!%p1142_p7)
}
  0x1a   :  { %s1336_s27 = smov 64   ;;  %s1337_s28 = smov 4  }
  0x1b   :  { %61 = dma.hbm_to_vmem [thread:$0]  %s1713_s5, 256, %s56_s30, [#allocation6], %s1336_s27, %s1336_s27, %s1337_s28  }
  0x1c   :  { %s1146_s22 = scalar_lea.hbm %s1715_s7, 256 }
  0x1d   :  { %p1147_p8 = scmp.ne.s32.totalorder %s1715_s7, %s1146_s22  ;;  %p1150_p9 = scmp.lt.u32.totalorder %s1146_s22, %s1715_s7 }
  0x1f   :  { %p1152_p10 = pnand %p1150_p9, %p1147_p8 }
  0x21   :  { %1155 = shalt.err (!%p1152_p10)
}
  0x22   :  { %s1156_s3 = scalar_lea.vmem %s1449_s21, 256  ;;  %p1161_p12 = scmp.lt.s32.totalorder %s1449_s21, %s1449_s21 }
  0x23   :  { %p1157_p11 = scmp.ne.s32.totalorder %s1449_s21, %s1156_s3  ;;  %p1162_p13 = scmp.lt.s32.totalorder %s1156_s3, %s1156_s3 }
  0x25   :  { %p1163_p0 = por %p1162_p13, %p1161_p12 }
  0x27   :  { %p1164_p1 = pnand %p1163_p0, %p1157_p11 }
  0x29   :  { %1167 = shalt.err (!%p1164_p1)
}
  0x2a   :  { %83 = dma.hbm_to_vmem [thread:$0]  %s1715_s7, 256, %s1449_s21, [#allocation9], %s1336_s27, %s1336_s27, %s1337_s28  }
  0x2b   :  { %s1338_s26 = smov [#allocation11]   ;;  %s1339_s0 = smov [#allocation2]  }
  0x2c   :  { %s102_s29 = sshll.u32 %s1338_s26, 4  ;;  %s41_s20 = sshll.u32 %s1339_s0, 4  ;;  %s103_s29 = int_to_ptr.vmem [resolvable:$true] %s102_s29  ;;  %s1486_s20 = int_to_ptr.vmem [resolvable:$true] %s41_s20 }
  0x2d   :  { %s1168_s2 = scalar_lea.hbm %s1718_s10, 16 }
  0x2e   :  { %p1169_p2 = scmp.ne.s32.totalorder %s1718_s10, %s1168_s2  ;;  %p1172_p3 = scmp.lt.u32.totalorder %s1168_s2, %s1718_s10 }
  0x30   :  { %p1174_p4 = pnand %p1172_p3, %p1169_p2 }
  0x32   :  { %1177 = shalt.err (!%p1174_p4)
}
  0x33   :  { %s1178_s7 = scalar_lea.vmem %s103_s29, 16  ;;  %s1182_s21 = scalar_lea.vmem %s103_s29, 32 }
  0x34   :  { %p1179_p5 = scmp.ne.s32.totalorder %s103_s29, %s1178_s7  ;;  %p1183_p6 = scmp.lt.s32.totalorder %s103_s29, %s103_s29 }
  0x35   :  { %p1184_p7 = scmp.lt.s32.totalorder %s1182_s21, %s1178_s7 }
  0x37   :  { %p1185_p8 = por %p1184_p7, %p1183_p6 }
  0x39   :  { %p1186_p9 = pnand %p1185_p8, %p1179_p5 }
  0x3b   :  { %1189 = shalt.err (!%p1186_p9)
}
  0x3c   :  { %105 = dma.hbm_to_vmem [thread:$0]  %s1718_s10, 16, %s103_s29, [#allocation12]  }
  0x3d   :  { %s1736_s1 = sld [smem:[#allocation26_spill]] }
  0x43   :  { %s1190_s22 = scalar_lea.hbm %s1736_s1, 256 }
  0x44   :  { %p1191_p10 = scmp.ne.s32.totalorder %s1736_s1, %s1190_s22  ;;  %p1194_p11 = scmp.lt.u32.totalorder %s1190_s22, %s1736_s1 }
  0x46   :  { %p1196_p12 = pnand %p1194_p11, %p1191_p10 }
  0x48   :  { %1199 = shalt.err (!%p1196_p12)
}
  0x49   :  { %s1200_s3 = scalar_lea.vmem %s1486_s20, 256  ;;  %p1205_p0 = scmp.lt.s32.totalorder %s1486_s20, %s1486_s20 }
  0x4a   :  { %p1201_p13 = scmp.ne.s32.totalorder %s1486_s20, %s1200_s3  ;;  %p1206_p1 = scmp.lt.s32.totalorder %s1200_s3, %s1200_s3 }
  0x4c   :  { %p1207_p2 = por %p1206_p1, %p1205_p0 }
  0x4e   :  { %p1208_p3 = pnand %p1207_p2, %p1201_p13 }
  0x50   :  { %1211 = shalt.err (!%p1208_p3)
}
  0x51   :  { %47 = dma.hbm_to_vmem [thread:$0]  %s1736_s1, 256, %s1486_s20, [#allocation3], %s1336_s27, %s1336_s27, %s1337_s28  }
  0x52   :  { %s1340_s7 = smov [#allocation7]   ;;  %s1341_s5 = smov [#allocation10]  }
  0x53   :  { %s68_s21 = sshll.u32 %s1340_s7, 4  ;;  %s90_s30 = sshll.u32 %s1341_s5, 4  ;;  %s69_s21 = int_to_ptr.vmem [resolvable:$true] %s68_s21  ;;  %s91_s30 = int_to_ptr.vmem [resolvable:$true] %s90_s30 }
  0x54   :  { %s1212_s22 = scalar_lea.hbm %s1714_s6, 16 }
  0x55   :  { %p1213_p4 = scmp.ne.s32.totalorder %s1714_s6, %s1212_s22  ;;  %p1216_p5 = scmp.lt.u32.totalorder %s1212_s22, %s1714_s6 }
  0x57   :  { %p1218_p6 = pnand %p1216_p5, %p1213_p4 }
  0x59   :  { %1221 = shalt.err (!%p1218_p6)
}
  0x5a   :  { %s1222_s27 = scalar_lea.vmem %s69_s21, 16  ;;  %s1226_s28 = scalar_lea.vmem %s69_s21, 32 }
  0x5b   :  { %p1223_p7 = scmp.ne.s32.totalorder %s69_s21, %s1222_s27  ;;  %p1227_p8 = scmp.lt.s32.totalorder %s69_s21, %s69_s21 }
  0x5c   :  { %p1228_p9 = scmp.lt.s32.totalorder %s1226_s28, %s1222_s27 }
  0x5e   :  { %p1229_p10 = por %p1228_p9, %p1227_p8 }
  0x60   :  { %p1230_p11 = pnand %p1229_p10, %p1223_p7 }
  0x62   :  { %1233 = shalt.err (!%p1230_p11)
}
  0x63   :  { %71 = dma.hbm_to_vmem [thread:$0]  %s1714_s6, 16, %s69_s21, [#allocation6]  }
  0x64   :  { %s1234_s29 = scalar_lea.hbm %s1716_s8, 16 }
  0x65   :  { %p1235_p12 = scmp.ne.s32.totalorder %s1716_s8, %s1234_s29  ;;  %p1238_p13 = scmp.lt.u32.totalorder %s1234_s29, %s1716_s8 }
  0x67   :  { %p1240_p0 = pnand %p1238_p13, %p1235_p12 }
  0x69   :  { %1243 = shalt.err (!%p1240_p0)
}
  0x6a   :  { %s1244_s22 = scalar_lea.vmem %s91_s30, 16  ;;  %s1248_s23 = scalar_lea.vmem %s91_s30, 32 }
  0x6b   :  { %p1245_p1 = scmp.ne.s32.totalorder %s91_s30, %s1244_s22  ;;  %p1249_p2 = scmp.lt.s32.totalorder %s91_s30, %s91_s30 }
  0x6c   :  { %p1250_p3 = scmp.lt.s32.totalorder %s1248_s23, %s1244_s22 }
  0x6e   :  { %p1251_p4 = por %p1250_p3, %p1249_p2 }
  0x70   :  { %p1252_p5 = pnand %p1251_p4, %p1245_p1 }
  0x72   :  { %1255 = shalt.err (!%p1252_p5)
}
  0x73   :  { %93 = dma.hbm_to_vmem [thread:$0]  %s1716_s8, 16, %s91_s30, [#allocation9]  }
  0x74   :  { %s1342_s2 = smov [#allocation13]   ;;  %s1343_s25 = smov [#allocation14]  }
  0x75   :  { %s112_s24 = sshll.u32 %s1342_s2, 4  ;;  %s122_s27 = sshll.u32 %s1343_s25, 4  ;;  %s113_s24 = int_to_ptr.vmem [resolvable:$true] %s112_s24  ;;  %s123_s27 = int_to_ptr.vmem [resolvable:$true] %s122_s27 }
  0x76   :  { %s1256_s1 = scalar_lea.hbm %s1719_s11, 16 }
  0x77   :  { %p1257_p6 = scmp.ne.s32.totalorder %s1719_s11, %s1256_s1  ;;  %p1260_p7 = scmp.lt.u32.totalorder %s1256_s1, %s1719_s11 }
  0x79   :  { %p1262_p8 = pnand %p1260_p7, %p1257_p6 }
  0x7b   :  { %1265 = shalt.err (!%p1262_p8)
}
  0x7c   :  { %s1266_s8 = scalar_lea.vmem %s113_s24, 16  ;;  %s1270_s30 = scalar_lea.vmem %s113_s24, 32 }
  0x7d   :  { %p1267_p9 = scmp.ne.s32.totalorder %s113_s24, %s1266_s8  ;;  %p1271_p10 = scmp.lt.s32.totalorder %s113_s24, %s113_s24 }
  0x7e   :  { %p1272_p11 = scmp.lt.s32.totalorder %s1270_s30, %s1266_s8 }
  0x80   :  { %p1273_p12 = por %p1272_p11, %p1271_p10 }
  0x82   :  { %p1274_p13 = pnand %p1273_p12, %p1267_p9 }
  0x84   :  { %1277 = shalt.err (!%p1274_p13)
}
  0x85   :  { %115 = dma.hbm_to_vmem [thread:$0]  %s1719_s11, 16, %s113_s24, [#allocation12]  }
  0x86   :  { %s1278_s23 = scalar_lea.hbm %s1720_s12, 16 }
  0x87   :  { %p1279_p0 = scmp.ne.s32.totalorder %s1720_s12, %s1278_s23  ;;  %p1282_p1 = scmp.lt.u32.totalorder %s1278_s23, %s1720_s12 }
  0x89   :  { %p1284_p2 = pnand %p1282_p1, %p1279_p0 }
  0x8b   :  { %1287 = shalt.err (!%p1284_p2)
}
  0x8c   :  { %s1288_s28 = scalar_lea.vmem %s123_s27, 16  ;;  %s1292_s20 = scalar_lea.vmem %s123_s27, 32 }
  0x8d   :  { %p1289_p3 = scmp.ne.s32.totalorder %s123_s27, %s1288_s28  ;;  %p1293_p4 = scmp.lt.s32.totalorder %s123_s27, %s123_s27 }
  0x8e   :  { %p1294_p5 = scmp.lt.s32.totalorder %s1292_s20, %s1288_s28 }
  0x90   :  { %p1295_p6 = por %p1294_p5, %p1293_p4 }
  0x92   :  { %p1296_p7 = pnand %p1295_p6, %p1289_p3 }
  0x94   :  { %1299 = shalt.err (!%p1296_p7)
}
  0x95   :  { %125 = dma.hbm_to_vmem [thread:$0]  %s1720_s12, 16, %s123_s27, [#allocation15]  }
  0x96   :  { %1322 = dma.done.wait [#allocation3], 256  }
  0x97   :  { %1323 = vsyncadd [#allocation3], 4294967040 }
  0x98   :  { %1324 = dma.done.wait [#allocation6], 272  }
  0x99   :  { %1325 = vsyncadd [#allocation6], 4294967024 }
  0x9a   :  { %1326 = dma.done.wait [#allocation9], 272  }
  0x9b   :  { %1327 = vsyncadd [#allocation9], 4294967024 }
  0x9c   :  { %1328 = dma.done.wait [#allocation12], 32  }
  0x9d   :  { %1329 = vsyncadd [#allocation12], 4294967264 }
  0x9e   :  { %1330 = dma.done.wait [#allocation15], 16  }
  0x9f   :  { %1331 = vsyncadd [#allocation15], 4294967280  ;;  %v1344_v0 = vmov 0.0   ;;  %vm1345_vm0 = vmmov 0   ;;  %v1090_v1 = vld [vmem:[#allocation5] sm:$0xff]   ;;  %v1091_v2 = vld [vmem:[#allocation2] sm:$0xff]  }
  0xa0   :  { %1007 = vmatprep.subr.bf16.mxu1 %v1344_v0  ;;  %999 = vmatprep.subr.bf16.mxu0 %v1344_v0  ;;  %v1092_v3 = vld [vmem:[#allocation5 + $0x8] sm:$0xff]   ;;  %s1737_s1 = sld [smem:[#allocation23_spill]]  ;;  %v1093_v6 = vld [vmem:[#allocation2 + $0x8] sm:$0xff]   ;;  %s1738_s8 = sld [smem:[#allocation24_spill]]  ;;  %vm193_vm1 = vcmask 261120   ;;  %vm498_vm2 = vcmask 1043456  }
  0xa1   :  { %1011 = vmatprep.mubr.msk.bf16.mxu1 %vm1345_vm0, %v1344_v0  ;;  %1003 = vmatprep.mubr.msk.bf16.mxu0 %vm1345_vm0, %v1344_v0  ;;  %v1094_v11 = vld [vmem:[#allocation8] sm:$0xff]   ;;  %v1095_v12 = vld [vmem:[#allocation8 + $0x8] sm:$0xff]   ;;  %v941_v13 = vld [vmem:[#allocation7] ss:$0 sm:$0xff]  ;;  %vm470_vm3 = vcmask 64512   ;;  %s1739_s20 = sld [smem:[#allocation25_spill]] }
  0xa2   :  { %1008 = vmatpush3.bf16.msra.mxu1 %v1090_v1  ;;  %1000 = vmatpush3.bf16.msra.mxu0 %v1091_v2  ;;  %v937_v14 = vld [vmem:[%s1712_s4] ss:$0 sm:$0xff]  ;;  %v945_v32 = vld [vmem:[#allocation10] ss:$0 sm:$0xff]  ;;  %vm823_vm4 = vcmask 523264   ;;  %s1346_s22 = smov [#allocation16]  }
  0xa3   :  { %1009 = vmatprep.subr.bf16.mxu1 %v1344_v0  ;;  %1001 = vmatprep.subr.bf16.mxu0 %v1344_v0  ;;  %s921_s23 = sshll.u32 %s1346_s22, 4  ;;  %s922_s23 = int_to_ptr.vmem [resolvable:$true] %s921_s23 }
  0xa4   :  { %s1300_s6 = scalar_lea.vmem %s922_s23, 256  ;;  %p1305_p9 = scmp.lt.s32.totalorder %s922_s23, %s922_s23 }
  0xa5   :  { %p1301_p8 = scmp.ne.s32.totalorder %s922_s23, %s1300_s6  ;;  %p1306_p10 = scmp.lt.s32.totalorder %s1300_s6, %s1300_s6 }
  0xa6   :  { %v165_v4 = vld [vmem:[%s1737_s1] sm:$0xff]  ;;  %v166_v5 = vld [vmem:[%s1737_s1 + $0x8] sm:$0xff]  ;;  %1010 = vmatpush3.bf16.msra.mxu1 %v1092_v3  ;;  %1002 = vmatpush3.bf16.msra.mxu0 %v1093_v6 }
  0xa7   :  { %v1585_v7 = vld [vmem:[%s1738_s8] sm:$0xff]  ;;  %v238_v8 = vpack.c.bf16 %v166_v5, %v165_v4  ;;  %v1590_v9 = vld [vmem:[%s1738_s8 + $0x8] sm:$0xff]  ;;  %1023 = vmatprep.subr.bf16.mxu1 %v1344_v0  ;;  %1015 = vmatprep.subr.bf16.mxu0 %v1344_v0  ;;  %p1307_p11 = por %p1306_p10, %p1305_p9 }
  0xa8   :  { %v169_v10 = vpack.c.bf16 %v1590_v9, %v1585_v7 }
  0xa9   :  { %1012 = vmatmul.mubr.msk.bf16.vlgmr.msra.gmra.mrb[0].mxu1 %vm193_vm1, %v238_v8  ;;  %p1308_p12 = pnand %p1307_p11, %p1301_p8 }
  0xaa   :  { %1004 = vmatmul.mubr.msk.bf16.vlgmr.msra.gmra.mrb[0].mxu0 %vm193_vm1, %v169_v10  ;;  %1025 = vmatprep.mubr.msk.bf16.mxu1 %vm1345_vm0, %v1344_v0 }
  0xab   :  { %1016 = vmatpush3.bf16.msra.mxu0 %v1094_v11  ;;  %1019 = vmatprep.mubr.msk.bf16.mxu0 %vm1345_vm0, %v1344_v0 }
  0xac   :  { %1017 = vmatprep.subr.bf16.mxu0 %v1344_v0 }
  0xaf   :  { %1018 = vmatpush3.bf16.msra.mxu0 %v1095_v12 }
  0xb0   :  { %1029 = vmatprep.subr.bf16.mxu0 %v1344_v0 }
  0xb2   :  { %1020 = vmatmul.mubr.msk.bf16.vlgmr.msra.gmra.mrb[4].mxu0 %vm193_vm1, %v238_v8 }
  0xb3   :  { %1031 = vmatprep.mubr.msk.bf16.mxu0 %vm1345_vm0, %v1344_v0 }
 0x17c   :  { %v299_v15 = vpop.f32.mrb[0].mxu1 }
 0x17d   :  { %v300_v16 = vadd.f32 %v941_v13, %v299_v15  ;;  %v1013_v17 = vpop.f32.mrb[1].mxu1  ;;  %v231_v18 = vpop.f32.mrb[0].mxu0 }
 0x17e   :  { %v302_v19 = vpop.f32.mrb[2].mxu1  ;;  %v232_v20 = vadd.f32 %v937_v14, %v231_v18  ;;  %v1005_v21 = vpop.f32.mrb[1].mxu0 }
 0x17f   :  { %v374_v22 = vpack.c.bf16 %v300_v16, %v300_v16  ;;  %v303_v23 = vadd.f32 %v941_v13, %v302_v19  ;;  %v1014_v24 = vpop.f32.mrb[3].mxu1  ;;  %v234_v25 = vpop.f32.mrb[2].mxu0  ;;  %v1096_v13 = vld [vmem:[%s1717_s9] sm:$0xff]  }
 0x180   :  { %v1006_v26 = vpop.f32.mrb[3].mxu0  ;;  %v370_v29 = vmul.f32 0.17677669, %v232_v20  ;;  %v235_v30 = vadd.f32 %v937_v14, %v234_v25  ;;  %v1097_v14 = vld [vmem:[%s1717_s9 + $0x8] sm:$0xff]   ;;  %v953_v24 = vld [vmem:[#allocation11] ss:$0 sm:$0xff] }
 0x181   :  { %v382_v27 = vsel %vm193_vm1, %v374_v22, 0  ;;  %v375_v28 = vpack.c.bf16 %v303_v23, %v303_v23 }
 0x182   :  { %1024 = vmatpush3.bf16.xpose.msra.mxu1 %v382_v27  ;;  %v372_v33 = vpack.c.bf16 %v370_v29, %v370_v29  ;;  %v371_v34 = vmul.f32 0.17677669, %v235_v30 }
 0x183   :  { %v428_v31 = vsel %vm193_vm1, %v375_v28, 0  ;;  %1035 = vmatprep.subr.bf16.mxu1 %v1344_v0 }
 0x184   :  { %1030 = vmatpush3.bf16.xpose.msra.mxu0 %v428_v31  ;;  %v373_v42 = vpack.c.bf16 %v371_v34, %v371_v34 }
 0x185   :  { %v363_v35 = vpop.f32.mrb[4].mxu0  ;;  %1041 = vmatprep.subr.bf16.mxu0 %v1344_v0 }
 0x186   :  { %v364_v36 = vadd.f32 %v945_v32, %v363_v35  ;;  %v1021_v37 = vpop.f32.mrb[5].mxu0 }
 0x187   :  { %v366_v38 = vpop.f32.mrb[6].mxu0 }
 0x188   :  { %v376_v39 = vpack.c.bf16 %v364_v36, %v364_v36  ;;  %v367_v40 = vadd.f32 %v945_v32, %v366_v38  ;;  %v1022_v41 = vpop.f32.mrb[7].mxu0 }
 0x189   :  { %1026 = vmatmul.mubr.msk.bf16.vlgmr.msra.gmra.mrb[4].mxu1 %vm193_vm1, %v372_v33 }
 0x18a   :  { %v500_v43 = vsel %vm498_vm2, %v376_v39, 0  ;;  %v377_v44 = vpack.c.bf16 %v367_v40, %v367_v40  ;;  %1037 = vmatprep.mubr.msk.bf16.mxu1 %vm1345_vm0, %v1344_v0 }
 0x18b   :  { %1032 = vmatmul.mubr.msk.bf16.vlgmr.msra.gmra.mrb[8].mxu0 %vm193_vm1, %v373_v42  ;;  %1036 = vmatpush3.bf16.msra.mxu1 %v500_v43 }
 0x18c   :  { %v546_v45 = vsel %vm498_vm2, %v377_v44, 0  ;;  %1043 = vmatprep.mubr.msk.bf16.mxu0 %vm1345_vm0, %v1344_v0  ;;  %1047 = vmatprep.subr.bf16.mxu1 %v1344_v0  ;;  %v1099_v44 = vld [vmem:[%s1721_s13 + $0x8] sm:$0xff]  }
 0x18d   :  { %1042 = vmatpush3.bf16.msra.mxu0 %v546_v45 }
 0x18e   :  { %1055 = vmatprep.subr.bf16.mxu0 %v1344_v0 }
 0x25c   :  { %v418_v46 = vpop.f32.mrb[4].mxu1 }
 0x25d   :  { %v1027_v47 = vpop.f32.mrb[5].mxu1  ;;  %v471_v48 = vsel %vm470_vm3, %v418_v46, -inf }
 0x25e   :  { %472 = vmax.xlane.f32.xlu0 %v471_v48  ;;  %v421_v49 = vpop.f32.mrb[6].mxu1  ;;  %v464_v50 = vpop.f32.mrb[8].mxu0 }
 0x25f   :  { %v1028_v51 = vpop.f32.mrb[7].mxu1  ;;  %v1033_v52 = vpop.f32.mrb[9].mxu0  ;;  %v474_v55 = vsel %vm470_vm3, %v464_v50, -inf }
 0x260   :  { %v467_v53 = vpop.f32.mrb[10].mxu0  ;;  %v957_v52 = vld [vmem:[#allocation13] ss:$0 sm:$0xff] }
 0x261   :  { %v1034_v54 = vpop.f32.mrb[11].mxu0 }
 0x262   :  { %475 = vmax.xlane.f32.xlu0 %v474_v55  ;;  %v958_v55 = vld [vmem:[#allocation14] ss:$0 sm:$0xff] }
 0x2eb   :  { %v473_v56 = vpop.xlane.xlu0 %472 }
 0x2ec   :  { %v477_v57 = vsub.f32 %v418_v46, %v473_v56 }
 0x2ee   :  { %v479_v58 = vmul.f32 1.442695, %v477_v57 }
 0x2ef   :  { %v476_v59 = vpop.xlane.xlu0 %475 }
 0x2f0   :  { %1104 = vpow2.f32 %v479_v58  ;;  %v478_v60 = vsub.f32 %v464_v50, %v476_v59 }
 0x2f2   :  { %v481_v61 = vmul.f32 1.442695, %v478_v60  ;;  %v167_v60 = vld [vmem:[%s1739_s20] sm:$0xff] }
 0x2f4   :  { %1106 = vpow2.f32 %v481_v61  ;;  %v168_v61 = vld [vmem:[%s1739_s20 + $0x8] sm:$0xff] }
 0x2fa   :  { %v1105_v62 = vpop.eup %1104 }
 0x2fb   :  { %v483_v63 = vsel %vm470_vm3, %v1105_v62, 0.0 }
 0x2fc   :  { %484 = vadd.xlane.f32.xlu1 %v483_v63 }
 0x2fe   :  { %v1107_v1 = vpop.eup %1106 }
 0x2ff   :  { %v486_v2 = vsel %vm470_vm3, %v1107_v1, 0.0 }
 0x300   :  { %487 = vadd.xlane.f32.xlu1 %v486_v2 }
 0x389   :  { %v485_v3 = vpop.xlane.xlu1 %484 }
 0x38a   :  { %1108 = vrcp.f32 %v485_v3  ;;  %v1100_v3 = vld [vmem:[%s1723_s15] sm:$0xff]  }
 0x38d   :  { %v488_v4 = vpop.xlane.xlu1 %487 }
 0x38e   :  { %1110 = vrcp.f32 %v488_v4  ;;  %v1101_v4 = vld [vmem:[%s1723_s15 + $0x8] sm:$0xff]  }
 0x394   :  { %v1109_v5 = vpop.eup %1108 }
 0x395   :  { %v491_v6 = vmul.f32 %v1109_v5, %v1105_v62  ;;  %v1102_v5 = vld [vmem:[%s1723_s15 + $0x10] sm:$0xff]  }
 0x397   :  { %v493_v8 = vpack.c.bf16 %v491_v6, %v491_v6  ;;  %v1103_v6 = vld [vmem:[%s1723_s15 + $0x18] sm:$0xff]  }
 0x398   :  { %v1111_v10 = vpop.eup %1110 }
 0x399   :  { %v492_v11 = vmul.f32 %v1111_v10, %v1107_v1  ;;  %1038 = vmatmul.mubr.msk.bf16.vlgmr.msra.gmra.mrb[8].mxu1 %vm470_vm3, %v493_v8  ;;  %v959_v8 = vld [vmem:[%s1722_s14] ss:$0 sm:$0xff] }
 0x39a   :  { %1051 = vmatprep.mubr.msk.bf16.mxu1 %vm1345_vm0, %v1344_v0  ;;  %1048 = vmatpush3.bf16.msra.mxu1 %v1096_v13 }
 0x39b   :  { %v494_v12 = vpack.c.bf16 %v492_v11, %v492_v11  ;;  %1049 = vmatprep.subr.bf16.mxu1 %v1344_v0 }
 0x39d   :  { %1044 = vmatmul.mubr.msk.bf16.vlgmr.msra.gmra.mrb[12].mxu0 %vm470_vm3, %v494_v12 }
 0x39e   :  { %1059 = vmatprep.mubr.msk.bf16.mxu0 %vm1345_vm0, %v1344_v0  ;;  %1050 = vmatpush3.bf16.msra.mxu1 %v1097_v14 }
 0x39f   :  { %1063 = vmatprep.subr.bf16.mxu1 %v1344_v0 }
 0x46c   :  { %v536_v15 = vpop.f32.mrb[8].mxu1 }
 0x46d   :  { %v1039_v16 = vpop.f32.mrb[9].mxu1 }
 0x46e   :  { %v539_v17 = vpop.f32.mrb[10].mxu1 }
 0x46f   :  { %v1040_v18 = vpop.f32.mrb[11].mxu1 }
 0x470   :  { %v582_v19 = vpop.f32.mrb[12].mxu0 }
 0x471   :  { %v588_v20 = vpack.c.bf16 %v582_v19, %v536_v15  ;;  %v1045_v21 = vpop.f32.mrb[13].mxu0 }
 0x472   :  { %v585_v22 = vpop.f32.mrb[14].mxu0 }
 0x473   :  { %v1046_v23 = vpop.f32.mrb[15].mxu0  ;;  %1052 = vmatmul.mubr.msk.bf16.vlgmr.msra.gmra.mrb[12].mxu1 %vm193_vm1, %v588_v20 }
 0x474   :  { %1071 = vmatprep.mubr.msk.bf16.mxu1 %vm1345_vm0, %v1344_v0  ;;  %1064 = vmatpush3.bf16.msra.mxu1 %v1100_v3 }
 0x475   :  { %1065 = vmatprep.subr.bf16.mxu1 %v1344_v0 }
 0x478   :  { %1066 = vmatpush3.bf16.msra.mxu1 %v1101_v4 }
 0x479   :  { %1067 = vmatprep.subr.bf16.mxu1 %v1344_v0 }
 0x47c   :  { %1068 = vmatpush3.bf16.msra.mxu1 %v1102_v5 }
 0x47d   :  { %1069 = vmatprep.subr.bf16.mxu1 %v1344_v0 }
 0x480   :  { %1070 = vmatpush3.bf16.msra.mxu1 %v1103_v6 }
 0x546   :  { %v649_v25 = vpop.f32.mrb[12].mxu1 }
 0x547   :  { %v650_v26 = vadd.f32 %v953_v24, %v649_v25  ;;  %v1053_v27 = vpop.f32.mrb[13].mxu1 }
 0x548   :  { %v652_v28 = vpop.f32.mrb[14].mxu1 }
 0x549   :  { %v653_v29 = vadd.f32 %v953_v24, %v652_v28  ;;  %v1054_v30 = vpop.f32.mrb[15].mxu1  ;;  %v656_v31 = vadd.f32 %v650_v26, %v1585_v7  ;;  %v963_v26 = vld [vmem:[%s1724_s16] ss:$0 sm:$0xff] }
 0x54b   :  { %v660_v32 = vsel %vm193_vm1, %v656_v31, 0.0  ;;  %v657_v33 = vadd.f32 %v653_v29, %v1590_v9  ;;  %v1098_v9 = vld [vmem:[%s1721_s13] sm:$0xff]  }
 0x54c   :  { %661 = vadd.xlane.f32.xlu0 %v660_v32  ;;  %1056 = vmatpush3.bf16.msra.mxu0 %v1098_v9 }
 0x54d   :  { %v663_v34 = vsel %vm193_vm1, %v657_v33, 0.0  ;;  %1057 = vmatprep.subr.bf16.mxu0 %v1344_v0 }
 0x54e   :  { %664 = vadd.xlane.f32.xlu1 %v663_v34 }
 0x550   :  { %1058 = vmatpush3.bf16.msra.mxu0 %v1099_v44 }
 0x5d9   :  { %v662_v35 = vpop.xlane.xlu0 %661 }
 0x5da   :  { %v667_v36 = vmul.f32 0.03125, %v662_v35 }
 0x5db   :  { %v665_v37 = vpop.xlane.xlu1 %664 }
 0x5dc   :  { %v669_v38 = vsub.f32 %v656_v31, %v667_v36  ;;  %v668_v39 = vmul.f32 0.03125, %v665_v37 }
 0x5de   :  { %v670_v40 = vsub.f32 %v657_v33, %v668_v39  ;;  %v671_v41 = vmul.f32 %v669_v38, %v669_v38 }
 0x5e0   :  { %v673_v42 = vsel %vm193_vm1, %v671_v41, 0.0  ;;  %v672_v43 = vmul.f32 %v670_v40, %v670_v40 }
 0x5e1   :  { %674 = vadd.xlane.f32.xlu0 %v673_v42 }
 0x5e2   :  { %v676_v7 = vsel %vm193_vm1, %v672_v43, 0.0 }
 0x5e3   :  { %677 = vadd.xlane.f32.xlu1 %v676_v7 }
 0x66e   :  { %v675_v45 = vpop.xlane.xlu0 %674 }
 0x66f   :  { %v679_v46 = vmul.f32 0.03125, %v675_v45 }
 0x670   :  { %v678_v47 = vpop.xlane.xlu1 %677 }
 0x671   :  { %v681_v48 = vadd.f32 1e-12, %v679_v46  ;;  %v680_v49 = vmul.f32 0.03125, %v678_v47 }
 0x673   :  { %1112 = vrsqrt.f32 %v681_v48  ;;  %v682_v50 = vadd.f32 1e-12, %v680_v49 }
 0x675   :  { %1114 = vrsqrt.f32 %v682_v50 }
 0x67d   :  { %v1113_v51 = vpop.eup %1112 }
 0x67e   :  { %v685_v53 = vmul.f32 %v1113_v51, %v669_v38 }
 0x67f   :  { %v1115_v54 = vpop.eup %1114 }
 0x680   :  { %v693_v56 = vmul.f32 %v957_v52, %v685_v53  ;;  %v686_v57 = vmul.f32 %v1115_v54, %v670_v40 }
 0x682   :  { %v694_v58 = vmul.f32 %v957_v52, %v686_v57  ;;  %v701_v59 = vadd.f32 %v958_v55, %v693_v56  ;;  %v969_v52 = vld [vmem:[%s1725_s17] ss:$0 sm:$0xff] }
 0x684   :  { %v702_v62 = vadd.f32 %v958_v55, %v694_v58  ;;  %v703_v63 = vadd.f32 %v701_v59, %v167_v60  ;;  %v970_v55 = vld [vmem:[%s1726_s18] ss:$0 sm:$0xff] }
 0x686   :  { %v704_v1 = vadd.f32 %v702_v62, %v168_v61 }
 0x688   :  { %v705_v2 = vpack.c.bf16 %v704_v1, %v703_v63 }
 0x68a   :  { %1060 = vmatmul.mubr.msk.bf16.vlgmr.msra.gmra.mrb[16].mxu0 %vm193_vm1, %v705_v2 }
 0x75d   :  { %v766_v10 = vpop.f32.mrb[16].mxu0 }
 0x75e   :  { %v767_v11 = vadd.f32 %v959_v8, %v766_v10  ;;  %v1061_v12 = vpop.f32.mrb[17].mxu0 }
 0x75f   :  { %v769_v13 = vpop.f32.mrb[18].mxu0 }
 0x760   :  { %v775_v14 = vmul.f32 0.70710677, %v767_v11  ;;  %v770_v15 = vadd.f32 %v959_v8, %v769_v13  ;;  %v1062_v16 = vpop.f32.mrb[19].mxu0  ;;  %v773_v20 = vmul.f32 0.5, %v767_v11 }
 0x762   :  { %1116 = verf.f32 %v775_v14  ;;  %v776_v17 = vmul.f32 0.70710677, %v770_v15  ;;  %v774_v21 = vmul.f32 0.5, %v770_v15 }
 0x764   :  { %1118 = verf.f32 %v776_v17 }
 0x76c   :  { %v1117_v0 = vpop.eup %1116 }
 0x76d   :  { %v779_v18 = vadd.f32 1.0, %v1117_v0 }
 0x76e   :  { %v1119_v19 = vpop.eup %1118 }
 0x76f   :  { %v780_v22 = vadd.f32 1.0, %v1119_v19  ;;  %v781_v23 = vmul.f32 %v779_v18, %v773_v20 }
 0x771   :  { %v782_v24 = vmul.f32 %v780_v22, %v774_v21 }
 0x773   :  { %v783_v25 = vpack.c.bf16 %v782_v24, %v781_v23 }
 0x775   :  { %1072 = vmatmul.mubr.msk.bf16.vlgmr.msra.gmra.mrb[16].mxu1 %vm823_vm4, %v783_v25 }
 0x848   :  { %v861_v27 = vpop.f32.mrb[16].mxu1 }
 0x849   :  { %v862_v28 = vadd.f32 %v963_v26, %v861_v27  ;;  %v1073_v29 = vpop.f32.mrb[17].mxu1 }
 0x84a   :  { %v864_v30 = vpop.f32.mrb[18].mxu1 }
 0x84b   :  { %v865_v31 = vadd.f32 %v963_v26, %v864_v30  ;;  %v1074_v32 = vpop.f32.mrb[19].mxu1  ;;  %v868_v33 = vadd.f32 %v862_v28, %v701_v59 }
 0x84d   :  { %v872_v34 = vsel %vm193_vm1, %v868_v33, 0.0  ;;  %v869_v35 = vadd.f32 %v865_v31, %v702_v62 }
 0x84e   :  { %873 = vadd.xlane.f32.xlu0 %v872_v34 }
 0x84f   :  { %v875_v36 = vsel %vm193_vm1, %v869_v35, 0.0 }
 0x850   :  { %876 = vadd.xlane.f32.xlu1 %v875_v36 }
 0x8db   :  { %v874_v37 = vpop.xlane.xlu0 %873 }
 0x8dc   :  { %v878_v38 = vmul.f32 0.03125, %v874_v37 }
 0x8dd   :  { %v877_v39 = vpop.xlane.xlu1 %876 }
 0x8de   :  { %v880_v40 = vsub.f32 %v868_v33, %v878_v38  ;;  %v879_v41 = vmul.f32 0.03125, %v877_v39 }
 0x8e0   :  { %v881_v42 = vsub.f32 %v869_v35, %v879_v41  ;;  %v882_v43 = vmul.f32 %v880_v40, %v880_v40 }
 0x8e2   :  { %v884_v7 = vsel %vm193_vm1, %v882_v43, 0.0  ;;  %v883_v9 = vmul.f32 %v881_v42, %v881_v42 }
 0x8e3   :  { %885 = vadd.xlane.f32.xlu0 %v884_v7 }
 0x8e4   :  { %v887_v44 = vsel %vm193_vm1, %v883_v9, 0.0 }
 0x8e5   :  { %888 = vadd.xlane.f32.xlu1 %v887_v44 }
 0x970   :  { %v886_v45 = vpop.xlane.xlu0 %885 }
 0x971   :  { %v890_v46 = vmul.f32 0.03125, %v886_v45 }
 0x972   :  { %v889_v47 = vpop.xlane.xlu1 %888 }
 0x973   :  { %v892_v48 = vadd.f32 1e-12, %v890_v46  ;;  %v891_v49 = vmul.f32 0.03125, %v889_v47 }
 0x975   :  { %1120 = vrsqrt.f32 %v892_v48  ;;  %v893_v50 = vadd.f32 1e-12, %v891_v49 }
 0x977   :  { %1122 = vrsqrt.f32 %v893_v50 }
 0x97f   :  { %v1121_v51 = vpop.eup %1120 }
 0x980   :  { %v896_v53 = vmul.f32 %v1121_v51, %v880_v40 }
 0x981   :  { %v1123_v54 = vpop.eup %1122 }
 0x982   :  { %v904_v56 = vmul.f32 %v969_v52, %v896_v53  ;;  %v897_v57 = vmul.f32 %v1123_v54, %v881_v42 }
 0x984   :  { %v905_v58 = vmul.f32 %v969_v52, %v897_v57  ;;  %v912_v59 = vadd.f32 %v970_v55, %v904_v56 }
 0x986   :  { %v913_v60 = vadd.f32 %v970_v55, %v905_v58  ;;  %914 = vst.msk [vmem:[#allocation16] sm:$0xff] %vm193_vm1, %v912_v59 }
 0x988   :  { %915 = vst.msk [vmem:[#allocation16 + $0x8] sm:$0xff] %vm193_vm1, %v913_v60 }
 0x989   :  { %1311 = shalt.err (!%p1308_p12)
}
 0x98a   :  { %s1312_s9 = scalar_lea.hbm %s1727_s19, 256 }
 0x98b   :  { %p1313_p13 = scmp.ne.s32.totalorder %s1727_s19, %s1312_s9  ;;  %p1316_p0 = scmp.lt.u32.totalorder %s1312_s9, %s1727_s19 }
 0x98d   :  { %p1318_p1 = pnand %p1316_p0, %p1313_p13 }
 0x98f   :  { %1321 = shalt.err (!%p1318_p1)
}
 0x990   :  { %s1347_s28 = smov 128   ;;  %s1348_s20 = smov 8  }
 0x991   :  { %927 = dma.vmem_to_hbm [thread:$0]  %s922_s23, 256, %s1727_s19, [#allocation4], %s1347_s28, %s1347_s28, %s1348_s20  }
 0x992   :  { %1332 = dma.done.wait [#allocation4], 256  }
 0x993   :  { %1333 = vsyncadd [#allocation4], 4294967040 }
 0x994   :  { %931 = vsyncpa [#allocation3], 1 }
 0x995   :  { %932 = vsyncpa [#allocation6], 1 }
 0x996   :  { %933 = vsyncpa [#allocation9], 1 }
 0x997   :  { %934 = vsyncpa [#allocation12], 1 }
 0x998   :  { %935 = vsyncpa [#allocation15], 1 }
 0x999   :  { %936 = vsyncpa [#allocation4], 1 }

// kernel: tpu_custom_call.1
= control target key start
LH: loop header
LB: loop body
LE: loop exit
PB: predicated region body
PF: predicated region fallthrough
CT: control target
= control target key end

     0   :  { %s1708_s0 = inlined_call_operand.vmem [shape: f32[2,8,32], index: 0, kind: input, shape index: {}]   ;;  %s1709_s1 = inlined_call_operand.vmem [shape: f32[2,8,32], index: 1, kind: input, shape index: {}]   ;;  %s1710_s2 = inlined_call_operand.vmem [shape: f32[2,8,32], index: 2, kind: input, shape index: {}]   ;;  %s1711_s3 = inlined_call_operand.hbm [shape: bf16[32,32], index: 3, kind: input, shape index: {}]   ;;  %s1712_s4 = inlined_call_operand.vmem [shape: f32[1,32], index: 4, kind: input, shape index: {}]   ;;  %s1713_s5 = inlined_call_operand.hbm [shape: bf16[32,32], index: 5, kind: input, shape index: {}]   ;;  %s1714_s6 = inlined_call_operand.hbm [shape: f32[1,32], index: 6, kind: input, shape index: {}]   ;;  %s1715_s7 = inlined_call_operand.hbm [shape: bf16[32,32], index: 7, kind: input, shape index: {}]   ;;  %s1716_s8 = inlined_call_operand.hbm [shape: f32[1,32], index: 8, kind: input, shape index: {}]   ;;  %s1717_s9 = inlined_call_operand.vmem [shape: bf16[32,32], index: 9, kind: input, shape index: {}]   ;;  %s1718_s10 = inlined_call_operand.hbm [shape: f32[1,32], index: 10, kind: input, shape index: {}]   ;;  %s1719_s11 = inlined_call_operand.hbm [shape: f32[1,32], index: 11, kind: input, shape index: {}]   ;;  %s1720_s12 = inlined_call_operand.hbm [shape: f32[1,32], index: 12, kind: input, shape index: {}]   ;;  %s1721_s13 = inlined_call_operand.vmem [shape: bf16[32,64], index: 13, kind: input, shape index: {}]   ;;  %s1722_s14 = inlined_call_operand.vmem [shape: f32[1,64], index: 14, kind: input, shape index: {}]   ;;  %s1723_s15 = inlined_call_operand.vmem [shape: bf16[64,32], index: 15, kind: input, shape index: {}]   ;;  %s1724_s16 = inlined_call_operand.vmem [shape: f32[1,32], index: 16, kind: input, shape index: {}]   ;;  %s1725_s17 = inlined_call_operand.vmem [shape: f32[1,32], index: 17, kind: input, shape index: {}]   ;;  %s1726_s18 = inlined_call_operand.vmem [shape: f32[1,32], index: 18, kind: input, shape index: {}]   ;;  %s1727_s19 = inlined_call_operand.hbm [shape: f32[2,8,32], index: 19, kind: output, shape index: {}]  }
   0x1   :  { %1732 = sst [smem:[#allocation23_spill]] %s1708_s0 }
   0x2   :  { %1733 = sst [smem:[#allocation24_spill]] %s1709_s1 }
   0x3   :  { %1734 = sst [smem:[#allocation25_spill]] %s1710_s2 }
   0x4   :  { %1735 = sst [smem:[#allocation26_spill]] %s1711_s3 }
   0x5   :  { %24 = vsyncpa [#allocation3], 0 }
   0x6   :  { %25 = vsyncpa [#allocation6], 0 }
   0x7   :  { %26 = vsyncpa [#allocation9], 0 }
   0x8   :  { %27 = vsyncpa [#allocation12], 0 }
   0x9   :  { %28 = vsyncpa [#allocation15], 0 }
   0xa   :  { %29 = vsyncpa [#allocation4], 0  ;;  %s1334_s0 = smov [#allocation5]   ;;  %s1335_s20 = smov [#allocation8]  }
   0xb   :  { %s55_s30 = sshll.u32 %s1334_s0, 4  ;;  %s77_s21 = sshll.u32 %s1335_s20, 4  ;;  %s56_s30 = int_to_ptr.vmem [resolvable:$true] %s55_s30  ;;  %s1449_s21 = int_to_ptr.vmem [resolvable:$true] %s77_s21 }
   0xc   :  { %s1124_s2 = scalar_lea.hbm %s1713_s5, 256 }
   0xd   :  { %p1125_p0 = scmp.ne.s32.totalorder %s1713_s5, %s1124_s2  ;;  %p1128_p1 = scmp.lt.u32.totalorder %s1124_s2, %s1713_s5 }
   0xf   :  { %p1130_p2 = pnand %p1128_p1, %p1125_p0 }
  0x11   :  { %1133 = shalt.err (!%p1130_p2)
}
  0x12   :  { %s1134_s26 = scalar_lea.vmem %s56_s30, 256  ;;  %p1139_p4 = scmp.lt.s32.totalorder %s56_s30, %s56_s30 }
  0x13   :  { %p1135_p3 = scmp.ne.s32.totalorder %s56_s30, %s1134_s26  ;;  %p1140_p5 = scmp.lt.s32.totalorder %s1134_s26, %s1134_s26 }
  0x15   :  { %p1141_p6 = por %p1140_p5, %p1139_p4 }
  0x17   :  { %p1142_p7 = pnand %p1141_p6, %p1135_p3 }
  0x19   :  { %1145 = shalt.err (!%p1142_p7)
}
  0x1a   :  { %s1336_s27 = smov 64   ;;  %s1337_s28 = smov 4  }
  0x1b   :  { %61 = dma.hbm_to_vmem [thread:$0]  %s1713_s5, 256, %s56_s30, [#allocation6], %s1336_s27, %s1336_s27, %s1337_s28  }
  0x1c   :  { %s1146_s22 = scalar_lea.hbm %s1715_s7, 256 }
  0x1d   :  { %p1147_p8 = scmp.ne.s32.totalorder %s1715_s7, %s1146_s22  ;;  %p1150_p9 = scmp.lt.u32.totalorder %s1146_s22, %s1715_s7 }
  0x1f   :  { %p1152_p10 = pnand %p1150_p9, %p1147_p8 }
  0x21   :  { %1155 = shalt.err (!%p1152_p10)
}
  0x22   :  { %s1156_s3 = scalar_lea.vmem %s1449_s21, 256  ;;  %p1161_p12 = scmp.lt.s32.totalorder %s1449_s21, %s1449_s21 }
  0x23   :  { %p1157_p11 = scmp.ne.s32.totalorder %s1449_s21, %s1156_s3  ;;  %p1162_p13 = scmp.lt.s32.totalorder %s1156_s3, %s1156_s3 }
  0x25   :  { %p1163_p0 = por %p1162_p13, %p1161_p12 }
  0x27   :  { %p1164_p1 = pnand %p1163_p0, %p1157_p11 }
  0x29   :  { %1167 = shalt.err (!%p1164_p1)
}
  0x2a   :  { %83 = dma.hbm_to_vmem [thread:$0]  %s1715_s7, 256, %s1449_s21, [#allocation9], %s1336_s27, %s1336_s27, %s1337_s28  }
  0x2b   :  { %s1338_s26 = smov [#allocation11]   ;;  %s1339_s0 = smov [#allocation2]  }
  0x2c   :  { %s102_s29 = sshll.u32 %s1338_s26, 4  ;;  %s41_s20 = sshll.u32 %s1339_s0, 4  ;;  %s103_s29 = int_to_ptr.vmem [resolvable:$true] %s102_s29  ;;  %s1486_s20 = int_to_ptr.vmem [resolvable:$true] %s41_s20 }
  0x2d   :  { %s1168_s2 = scalar_lea.hbm %s1718_s10, 16 }
  0x2e   :  { %p1169_p2 = scmp.ne.s32.totalorder %s1718_s10, %s1168_s2  ;;  %p1172_p3 = scmp.lt.u32.totalorder %s1168_s2, %s1718_s10 }
  0x30   :  { %p1174_p4 = pnand %p1172_p3, %p1169_p2 }
  0x32   :  { %1177 = shalt.err (!%p1174_p4)
}
  0x33   :  { %s1178_s7 = scalar_lea.vmem %s103_s29, 16  ;;  %s1182_s21 = scalar_lea.vmem %s103_s29, 32 }
  0x34   :  { %p1179_p5 = scmp.ne.s32.totalorder %s103_s29, %s1178_s7  ;;  %p1183_p6 = scmp.lt.s32.totalorder %s103_s29, %s103_s29 }
  0x35   :  { %p1184_p7 = scmp.lt.s32.totalorder %s1182_s21, %s1178_s7 }
  0x37   :  { %p1185_p8 = por %p1184_p7, %p1183_p6 }
  0x39   :  { %p1186_p9 = pnand %p1185_p8, %p1179_p5 }
  0x3b   :  { %1189 = shalt.err (!%p1186_p9)
}
  0x3c   :  { %105 = dma.hbm_to_vmem [thread:$0]  %s1718_s10, 16, %s103_s29, [#allocation12]  }
  0x3d   :  { %s1736_s1 = sld [smem:[#allocation26_spill]] }
  0x43   :  { %s1190_s22 = scalar_lea.hbm %s1736_s1, 256 }
  0x44   :  { %p1191_p10 = scmp.ne.s32.totalorder %s1736_s1, %s1190_s22  ;;  %p1194_p11 = scmp.lt.u32.totalorder %s1190_s22, %s1736_s1 }
  0x46   :  { %p1196_p12 = pnand %p1194_p11, %p1191_p10 }
  0x48   :  { %1199 = shalt.err (!%p1196_p12)
}
  0x49   :  { %s1200_s3 = scalar_lea.vmem %s1486_s20, 256  ;;  %p1205_p0 = scmp.lt.s32.totalorder %s1486_s20, %s1486_s20 }
  0x4a   :  { %p1201_p13 = scmp.ne.s32.totalorder %s1486_s20, %s1200_s3  ;;  %p1206_p1 = scmp.lt.s32.totalorder %s1200_s3, %s1200_s3 }
  0x4c   :  { %p1207_p2 = por %p1206_p1, %p1205_p0 }
  0x4e   :  { %p1208_p3 = pnand %p1207_p2, %p1201_p13 }
  0x50   :  { %1211 = shalt.err (!%p1208_p3)
}
  0x51   :  { %47 = dma.hbm_to_vmem [thread:$0]  %s1736_s1, 256, %s1486_s20, [#allocation3], %s1336_s27, %s1336_s27, %s1337_s28  }
  0x52   :  { %s1340_s7 = smov [#allocation7]   ;;  %s1341_s5 = smov [#allocation10]  }
  0x53   :  { %s68_s21 = sshll.u32 %s1340_s7, 4  ;;  %s90_s30 = sshll.u32 %s1341_s5, 4  ;;  %s69_s21 = int_to_ptr.vmem [resolvable:$true] %s68_s21  ;;  %s91_s30 = int_to_ptr.vmem [resolvable:$true] %s90_s30 }
  0x54   :  { %s1212_s22 = scalar_lea.hbm %s1714_s6, 16 }
  0x55   :  { %p1213_p4 = scmp.ne.s32.totalorder %s1714_s6, %s1212_s22  ;;  %p1216_p5 = scmp.lt.u32.totalorder %s1212_s22, %s1714_s6 }
  0x57   :  { %p1218_p6 = pnand %p1216_p5, %p1213_p4 }
  0x59   :  { %1221 = shalt.err (!%p1218_p6)
}
  0x5a   :  { %s1222_s27 = scalar_lea.vmem %s69_s21, 16  ;;  %s1226_s28 = scalar_lea.vmem %s69_s21, 32 }
  0x5b   :  { %p1223_p7 = scmp.ne.s32.totalorder %s69_s21, %s1222_s27  ;;  %p1227_p8 = scmp.lt.s32.totalorder %s69_s21, %s69_s21 }
  0x5c   :  { %p1228_p9 = scmp.lt.s32.totalorder %s1226_s28, %s1222_s27 }
  0x5e   :  { %p1229_p10 = por %p1228_p9, %p1227_p8 }
  0x60   :  { %p1230_p11 = pnand %p1229_p10, %p1223_p7 }
  0x62   :  { %1233 = shalt.err (!%p1230_p11)
}
  0x63   :  { %71 = dma.hbm_to_vmem [thread:$0]  %s1714_s6, 16, %s69_s21, [#allocation6]  }
  0x64   :  { %s1234_s29 = scalar_lea.hbm %s1716_s8, 16 }
  0x65   :  { %p1235_p12 = scmp.ne.s32.totalorder %s1716_s8, %s1234_s29  ;;  %p1238_p13 = scmp.lt.u32.totalorder %s1234_s29, %s1716_s8 }
  0x67   :  { %p1240_p0 = pnand %p1238_p13, %p1235_p12 }
  0x69   :  { %1243 = shalt.err (!%p1240_p0)
}
  0x6a   :  { %s1244_s22 = scalar_lea.vmem %s91_s30, 16  ;;  %s1248_s23 = scalar_lea.vmem %s91_s30, 32 }
  0x6b   :  { %p1245_p1 = scmp.ne.s32.totalorder %s91_s30, %s1244_s22  ;;  %p1249_p2 = scmp.lt.s32.totalorder %s91_s30, %s91_s30 }
  0x6c   :  { %p1250_p3 = scmp.lt.s32.totalorder %s1248_s23, %s1244_s22 }
  0x6e   :  { %p1251_p4 = por %p1250_p3, %p1249_p2 }
  0x70   :  { %p1252_p5 = pnand %p1251_p4, %p1245_p1 }
  0x72   :  { %1255 = shalt.err (!%p1252_p5)
}
  0x73   :  { %93 = dma.hbm_to_vmem [thread:$0]  %s1716_s8, 16, %s91_s30, [#allocation9]  }
  0x74   :  { %s1342_s2 = smov [#allocation13]   ;;  %s1343_s25 = smov [#allocation14]  }
  0x75   :  { %s112_s24 = sshll.u32 %s1342_s2, 4  ;;  %s122_s27 = sshll.u32 %s1343_s25, 4  ;;  %s113_s24 = int_to_ptr.vmem [resolvable:$true] %s112_s24  ;;  %s123_s27 = int_to_ptr.vmem [resolvable:$true] %s122_s27 }
  0x76   :  { %s1256_s1 = scalar_lea.hbm %s1719_s11, 16 }
  0x77   :  { %p1257_p6 = scmp.ne.s32.totalorder %s1719_s11, %s1256_s1  ;;  %p1260_p7 = scmp.lt.u32.totalorder %s1256_s1, %s1719_s11 }
  0x79   :  { %p1262_p8 = pnand %p1260_p7, %p1257_p6 }
  0x7b   :  { %1265 = shalt.err (!%p1262_p8)
}
  0x7c   :  { %s1266_s8 = scalar_lea.vmem %s113_s24, 16  ;;  %s1270_s30 = scalar_lea.vmem %s113_s24, 32 }
  0x7d   :  { %p1267_p9 = scmp.ne.s32.totalorder %s113_s24, %s1266_s8  ;;  %p1271_p10 = scmp.lt.s32.totalorder %s113_s24, %s113_s24 }
  0x7e   :  { %p1272_p11 = scmp.lt.s32.totalorder %s1270_s30, %s1266_s8 }
  0x80   :  { %p1273_p12 = por %p1272_p11, %p1271_p10 }
  0x82   :  { %p1274_p13 = pnand %p1273_p12, %p1267_p9 }
  0x84   :  { %1277 = shalt.err (!%p1274_p13)
}
  0x85   :  { %115 = dma.hbm_to_vmem [thread:$0]  %s1719_s11, 16, %s113_s24, [#allocation12]  }
  0x86   :  { %s1278_s23 = scalar_lea.hbm %s1720_s12, 16 }
  0x87   :  { %p1279_p0 = scmp.ne.s32.totalorder %s1720_s12, %s1278_s23  ;;  %p1282_p1 = scmp.lt.u32.totalorder %s1278_s23, %s1720_s12 }
  0x89   :  { %p1284_p2 = pnand %p1282_p1, %p1279_p0 }
  0x8b   :  { %1287 = shalt.err (!%p1284_p2)
}
  0x8c   :  { %s1288_s28 = scalar_lea.vmem %s123_s27, 16  ;;  %s1292_s20 = scalar_lea.vmem %s123_s27, 32 }
  0x8d   :  { %p1289_p3 = scmp.ne.s32.totalorder %s123_s27, %s1288_s28  ;;  %p1293_p4 = scmp.lt.s32.totalorder %s123_s27, %s123_s27 }
  0x8e   :  { %p1294_p5 = scmp.lt.s32.totalorder %s1292_s20, %s1288_s28 }
  0x90   :  { %p1295_p6 = por %p1294_p5, %p1293_p4 }
  0x92   :  { %p1296_p7 = pnand %p1295_p6, %p1289_p3 }
  0x94   :  { %1299 = shalt.err (!%p1296_p7)
}
  0x95   :  { %125 = dma.hbm_to_vmem [thread:$0]  %s1720_s12, 16, %s123_s27, [#allocation15]  }
  0x96   :  { %1322 = dma.done.wait [#allocation3], 256  }
  0x97   :  { %1323 = vsyncadd [#allocation3], 4294967040 }
  0x98   :  { %1324 = dma.done.wait [#allocation6], 272  }
  0x99   :  { %1325 = vsyncadd [#allocation6], 4294967024 }
  0x9a   :  { %1326 = dma.done.wait [#allocation9], 272  }
  0x9b   :  { %1327 = vsyncadd [#allocation9], 4294967024 }
  0x9c   :  { %1328 = dma.done.wait [#allocation12], 32  }
  0x9d   :  { %1329 = vsyncadd [#allocation12], 4294967264 }
  0x9e   :  { %1330 = dma.done.wait [#allocation15], 16  }
  0x9f   :  { %1331 = vsyncadd [#allocation15], 4294967280  ;;  %v1344_v0 = vmov 0.0   ;;  %vm1345_vm0 = vmmov 0   ;;  %v1090_v1 = vld [vmem:[#allocation5] sm:$0xff]   ;;  %v1091_v2 = vld [vmem:[#allocation2] sm:$0xff]  }
  0xa0   :  { %1007 = vmatprep.subr.bf16.mxu1 %v1344_v0  ;;  %999 = vmatprep.subr.bf16.mxu0 %v1344_v0  ;;  %v1092_v3 = vld [vmem:[#allocation5 + $0x8] sm:$0xff]   ;;  %s1737_s1 = sld [smem:[#allocation23_spill]]  ;;  %v1093_v6 = vld [vmem:[#allocation2 + $0x8] sm:$0xff]   ;;  %s1738_s8 = sld [smem:[#allocation24_spill]]  ;;  %vm193_vm1 = vcmask 261120   ;;  %vm498_vm2 = vcmask 1043456  }
  0xa1   :  { %1011 = vmatprep.mubr.msk.bf16.mxu1 %vm1345_vm0, %v1344_v0  ;;  %1003 = vmatprep.mubr.msk.bf16.mxu0 %vm1345_vm0, %v1344_v0  ;;  %v1094_v11 = vld [vmem:[#allocation8] sm:$0xff]   ;;  %v1095_v12 = vld [vmem:[#allocation8 + $0x8] sm:$0xff]   ;;  %v941_v13 = vld [vmem:[#allocation7] ss:$0 sm:$0xff]  ;;  %vm470_vm3 = vcmask 64512   ;;  %s1739_s20 = sld [smem:[#allocation25_spill]] }
  0xa2   :  { %1008 = vmatpush3.bf16.msra.mxu1 %v1090_v1  ;;  %1000 = vmatpush3.bf16.msra.mxu0 %v1091_v2  ;;  %v937_v14 = vld [vmem:[%s1712_s4] ss:$0 sm:$0xff]  ;;  %v945_v32 = vld [vmem:[#allocation10] ss:$0 sm:$0xff]  ;;  %vm823_vm4 = vcmask 523264   ;;  %s1346_s22 = smov [#allocation16]  }
  0xa3   :  { %1009 = vmatprep.subr.bf16.mxu1 %v1344_v0  ;;  %1001 = vmatprep.subr.bf16.mxu0 %v1344_v0  ;;  %s921_s23 = sshll.u32 %s1346_s22, 4  ;;  %s922_s23 = int_to_ptr.vmem [resolvable:$true] %s921_s23 }
  0xa4   :  { %s1300_s6 = scalar_lea.vmem %s922_s23, 256  ;;  %p1305_p9 = scmp.lt.s32.totalorder %s922_s23, %s922_s23 }
  0xa5   :  { %p1301_p8 = scmp.ne.s32.totalorder %s922_s23, %s1300_s6  ;;  %p1306_p10 = scmp.lt.s32.totalorder %s1300_s6, %s1300_s6 }
  0xa6   :  { %v165_v4 = vld [vmem:[%s1737_s1] sm:$0xff]  ;;  %v166_v5 = vld [vmem:[%s1737_s1 + $0x8] sm:$0xff]  ;;  %1010 = vmatpush3.bf16.msra.mxu1 %v1092_v3  ;;  %1002 = vmatpush3.bf16.msra.mxu0 %v1093_v6 }
  0xa7   :  { %v1585_v7 = vld [vmem:[%s1738_s8] sm:$0xff]  ;;  %v238_v8 = vpack.c.bf16 %v166_v5, %v165_v4  ;;  %v1590_v9 = vld [vmem:[%s1738_s8 + $0x8] sm:$0xff]  ;;  %1023 = vmatprep.subr.bf16.mxu1 %v1344_v0  ;;  %1015 = vmatprep.subr.bf16.mxu0 %v1344_v0  ;;  %p1307_p11 = por %p1306_p10, %p1305_p9 }
  0xa8   :  { %v169_v10 = vpack.c.bf16 %v1590_v9, %v1585_v7 }
  0xa9   :  { %1012 = vmatmul.mubr.msk.bf16.vlgmr.msra.gmra.mrb[0].mxu1 %vm193_vm1, %v238_v8  ;;  %p1308_p12 = pnand %p1307_p11, %p1301_p8 }
  0xaa   :  { %1004 = vmatmul.mubr.msk.bf16.vlgmr.msra.gmra.mrb[0].mxu0 %vm193_vm1, %v169_v10  ;;  %1025 = vmatprep.mubr.msk.bf16.mxu1 %vm1345_vm0, %v1344_v0 }
  0xab   :  { %1016 = vmatpush3.bf16.msra.mxu0 %v1094_v11  ;;  %1019 = vmatprep.mubr.msk.bf16.mxu0 %vm1345_vm0, %v1344_v0 }
  0xac   :  { %1017 = vmatprep.subr.bf16.mxu0 %v1344_v0 }
  0xaf   :  { %1018 = vmatpush3.bf16.msra.mxu0 %v1095_v12 }
  0xb0   :  { %1029 = vmatprep.subr.bf16.mxu0 %v1344_v0 }
  0xb2   :  { %1020 = vmatmul.mubr.msk.bf16.vlgmr.msra.gmra.mrb[4].mxu0 %vm193_vm1, %v238_v8 }
  0xb3   :  { %1031 = vmatprep.mubr.msk.bf16.mxu0 %vm1345_vm0, %v1344_v0 }
 0x17c   :  { %v299_v15 = vpop.f32.mrb[0].mxu1 }
 0x17d   :  { %v300_v16 = vadd.f32 %v941_v13, %v299_v15  ;;  %v1013_v17 = vpop.f32.mrb[1].mxu1  ;;  %v231_v18 = vpop.f32.mrb[0].mxu0 }
 0x17e   :  { %v302_v19 = vpop.f32.mrb[2].mxu1  ;;  %v232_v20 = vadd.f32 %v937_v14, %v231_v18  ;;  %v1005_v21 = vpop.f32.mrb[1].mxu0 }
 0x17f   :  { %v374_v22 = vpack.c.bf16 %v300_v16, %v300_v16  ;;  %v303_v23 = vadd.f32 %v941_v13, %v302_v19  ;;  %v1014_v24 = vpop.f32.mrb[3].mxu1  ;;  %v234_v25 = vpop.f32.mrb[2].mxu0  ;;  %v1096_v13 = vld [vmem:[%s1717_s9] sm:$0xff]  }
 0x180   :  { %v1006_v26 = vpop.f32.mrb[3].mxu0  ;;  %v370_v29 = vmul.f32 0.17677669, %v232_v20  ;;  %v235_v30 = vadd.f32 %v937_v14, %v234_v25  ;;  %v1097_v14 = vld [vmem:[%s1717_s9 + $0x8] sm:$0xff]   ;;  %v953_v24 = vld [vmem:[#allocation11] ss:$0 sm:$0xff] }
 0x181   :  { %v382_v27 = vsel %vm193_vm1, %v374_v22, 0  ;;  %v375_v28 = vpack.c.bf16 %v303_v23, %v303_v23 }
 0x182   :  { %1024 = vmatpush3.bf16.xpose.msra.mxu1 %v382_v27  ;;  %v372_v33 = vpack.c.bf16 %v370_v29, %v370_v29  ;;  %v371_v34 = vmul.f32 0.17677669, %v235_v30 }
 0x183   :  { %v428_v31 = vsel %vm193_vm1, %v375_v28, 0  ;;  %1035 = vmatprep.subr.bf16.mxu1 %v1344_v0 }
 0x184   :  { %1030 = vmatpush3.bf16.xpose.msra.mxu0 %v428_v31  ;;  %v373_v42 = vpack.c.bf16 %v371_v34, %v371_v34 }
 0x185   :  { %v363_v35 = vpop.f32.mrb[4].mxu0  ;;  %1041 = vmatprep.subr.bf16.mxu0 %v1344_v0 }
 0x186   :  { %v364_v36 = vadd.f32 %v945_v32, %v363_v35  ;;  %v1021_v37 = vpop.f32.mrb[5].mxu0 }
 0x187   :  { %v366_v38 = vpop.f32.mrb[6].mxu0 }
 0x188   :  { %v376_v39 = vpack.c.bf16 %v364_v36, %v364_v36  ;;  %v367_v40 = vadd.f32 %v945_v32, %v366_v38  ;;  %v1022_v41 = vpop.f32.mrb[7].mxu0 }
 0x189   :  { %1026 = vmatmul.mubr.msk.bf16.vlgmr.msra.gmra.mrb[4].mxu1 %vm193_vm1, %v372_v33 }
 0x18a   :  { %v500_v43 = vsel %vm498_vm2, %v376_v39, 0  ;;  %v377_v44 = vpack.c.bf16 %v367_v40, %v367_v40  ;;  %1037 = vmatprep.mubr.msk.bf16.mxu1 %vm1345_vm0, %v1344_v0 }
 0x18b   :  { %1032 = vmatmul.mubr.msk.bf16.vlgmr.msra.gmra.mrb[8].mxu0 %vm193_vm1, %v373_v42  ;;  %1036 = vmatpush3.bf16.msra.mxu1 %v500_v43 }
 0x18c   :  { %v546_v45 = vsel %vm498_vm2, %v377_v44, 0  ;;  %1043 = vmatprep.mubr.msk.bf16.mxu0 %vm1345_vm0, %v1344_v0  ;;  %1047 = vmatprep.subr.bf16.mxu1 %v1344_v0  ;;  %v1099_v44 = vld [vmem:[%s1721_s13 + $0x8] sm:$0xff]  }
 0x18d   :  { %1042 = vmatpush3.bf16.msra.mxu0 %v546_v45 }
 0x18e   :  { %1055 = vmatprep.subr.bf16.mxu0 %v1344_v0 }
 0x25c   :  { %v418_v46 = vpop.f32.mrb[4].mxu1 }
 0x25d   :  { %v1027_v47 = vpop.f32.mrb[5].mxu1  ;;  %v471_v48 = vsel %vm470_vm3, %v418_v46, -inf }
 0x25e   :  { %472 = vmax.xlane.f32.xlu0 %v471_v48  ;;  %v421_v49 = vpop.f32.mrb[6].mxu1  ;;  %v464_v50 = vpop.f32.mrb[8].mxu0 }
 0x25f   :  { %v1028_v51 = vpop.f32.mrb[7].mxu1  ;;  %v1033_v52 = vpop.f32.mrb[9].mxu0  ;;  %v474_v55 = vsel %vm470_vm3, %v464_v50, -inf }
 0x260   :  { %v467_v53 = vpop.f32.mrb[10].mxu0  ;;  %v957_v52 = vld [vmem:[#allocation13] ss:$0 sm:$0xff] }
 0x261   :  { %v1034_v54 = vpop.f32.mrb[11].mxu0 }
 0x262   :  { %475 = vmax.xlane.f32.xlu0 %v474_v55  ;;  %v958_v55 = vld [vmem:[#allocation14] ss:$0 sm:$0xff] }
 0x2eb   :  { %v473_v56 = vpop.xlane.xlu0 %472 }
 0x2ec   :  { %v477_v57 = vsub.f32 %v418_v46, %v473_v56 }
 0x2ee   :  { %v479_v58 = vmul.f32 1.442695, %v477_v57 }
 0x2ef   :  { %v476_v59 = vpop.xlane.xlu0 %475 }
 0x2f0   :  { %1104 = vpow2.f32 %v479_v58  ;;  %v478_v60 = vsub.f32 %v464_v50, %v476_v59 }
 0x2f2   :  { %v481_v61 = vmul.f32 1.442695, %v478_v60  ;;  %v167_v60 = vld [vmem:[%s1739_s20] sm:$0xff] }
 0x2f4   :  { %1106 = vpow2.f32 %v481_v61  ;;  %v168_v61 = vld [vmem:[%s1739_s20 + $0x8] sm:$0xff] }
 0x2fa   :  { %v1105_v62 = vpop.eup %1104 }
 0x2fb   :  { %v483_v63 = vsel %vm470_vm3, %v1105_v62, 0.0 }
 0x2fc   :  { %484 = vadd.xlane.f32.xlu1 %v483_v63 }
 0x2fe   :  { %v1107_v1 = vpop.eup %1106 }
 0x2ff   :  { %v486_v2 = vsel %vm470_vm3, %v1107_v1, 0.0 }
 0x300   :  { %487 = vadd.xlane.f32.xlu1 %v486_v2 }
 0x389   :  { %v485_v3 = vpop.xlane.xlu1 %484 }
 0x38a   :  { %1108 = vrcp.f32 %v485_v3  ;;  %v1100_v3 = vld [vmem:[%s1723_s15] sm:$0xff]  }
 0x38d   :  { %v488_v4 = vpop.xlane.xlu1 %487 }
 0x38e   :  { %1110 = vrcp.f32 %v488_v4  ;;  %v1101_v4 = vld [vmem:[%s1723_s15 + $0x8] sm:$0xff]  }
 0x394   :  { %v1109_v5 = vpop.eup %1108 }
 0x395   :  { %v491_v6 = vmul.f32 %v1109_v5, %v1105_v62  ;;  %v1102_v5 = vld [vmem:[%s1723_s15 + $0x10] sm:$0xff]  }
 0x397   :  { %v493_v8 = vpack.c.bf16 %v491_v6, %v491_v6  ;;  %v1103_v6 = vld [vmem:[%s1723_s15 + $0x18] sm:$0xff]  }
 0x398   :  { %v1111_v10 = vpop.eup %1110 }
 0x399   :  { %v492_v11 = vmul.f32 %v1111_v10, %v1107_v1  ;;  %1038 = vmatmul.mubr.msk.bf16.vlgmr.msra.gmra.mrb[8].mxu1 %vm470_vm3, %v493_v8  ;;  %v959_v8 = vld [vmem:[%s1722_s14] ss:$0 sm:$0xff] }
 0x39a   :  { %1051 = vmatprep.mubr.msk.bf16.mxu1 %vm1345_vm0, %v1344_v0  ;;  %1048 = vmatpush3.bf16.msra.mxu1 %v1096_v13 }
 0x39b   :  { %v494_v12 = vpack.c.bf16 %v492_v11, %v492_v11  ;;  %1049 = vmatprep.subr.bf16.mxu1 %v1344_v0 }
 0x39d   :  { %1044 = vmatmul.mubr.msk.bf16.vlgmr.msra.gmra.mrb[12].mxu0 %vm470_vm3, %v494_v12 }
 0x39e   :  { %1059 = vmatprep.mubr.msk.bf16.mxu0 %vm1345_vm0, %v1344_v0  ;;  %1050 = vmatpush3.bf16.msra.mxu1 %v1097_v14 }
 0x39f   :  { %1063 = vmatprep.subr.bf16.mxu1 %v1344_v0 }
 0x46c   :  { %v536_v15 = vpop.f32.mrb[8].mxu1 }
 0x46d   :  { %v1039_v16 = vpop.f32.mrb[9].mxu1 }
 0x46e   :  { %v539_v17 = vpop.f32.mrb[10].mxu1 }
 0x46f   :  { %v1040_v18 = vpop.f32.mrb[11].mxu1 }
 0x470   :  { %v582_v19 = vpop.f32.mrb[12].mxu0 }
 0x471   :  { %v588_v20 = vpack.c.bf16 %v582_v19, %v536_v15  ;;  %v1045_v21 = vpop.f32.mrb[13].mxu0 }
 0x472   :  { %v585_v22 = vpop.f32.mrb[14].mxu0 }
 0x473   :  { %v1046_v23 = vpop.f32.mrb[15].mxu0  ;;  %1052 = vmatmul.mubr.msk.bf16.vlgmr.msra.gmra.mrb[12].mxu1 %vm193_vm1, %v588_v20 }
 0x474   :  { %1071 = vmatprep.mubr.msk.bf16.mxu1 %vm1345_vm0, %v1344_v0  ;;  %1064 = vmatpush3.bf16.msra.mxu1 %v1100_v3 }
 0x475   :  { %1065 = vmatprep.subr.bf16.mxu1 %v1344_v0 }
 0x478   :  { %1066 = vmatpush3.bf16.msra.mxu1 %v1101_v4 }
 0x479   :  { %1067 = vmatprep.subr.bf16.mxu1 %v1344_v0 }
 0x47c   :  { %1068 = vmatpush3.bf16.msra.mxu1 %v1102_v5 }
 0x47d   :  { %1069 = vmatprep.subr.bf16.mxu1 %v1344_v0 }
 0x480   :  { %1070 = vmatpush3.bf16.msra.mxu1 %v1103_v6 }
 0x546   :  { %v649_v25 = vpop.f32.mrb[12].mxu1 }
 0x547   :  { %v650_v26 = vadd.f32 %v953_v24, %v649_v25  ;;  %v1053_v27 = vpop.f32.mrb[13].mxu1 }
 0x548   :  { %v652_v28 = vpop.f32.mrb[14].mxu1 }
 0x549   :  { %v653_v29 = vadd.f32 %v953_v24, %v652_v28  ;;  %v1054_v30 = vpop.f32.mrb[15].mxu1  ;;  %v656_v31 = vadd.f32 %v650_v26, %v1585_v7  ;;  %v963_v26 = vld [vmem:[%s1724_s16] ss:$0 sm:$0xff] }
 0x54b   :  { %v660_v32 = vsel %vm193_vm1, %v656_v31, 0.0  ;;  %v657_v33 = vadd.f32 %v653_v29, %v1590_v9  ;;  %v1098_v9 = vld [vmem:[%s1721_s13] sm:$0xff]  }
 0x54c   :  { %661 = vadd.xlane.f32.xlu0 %v660_v32  ;;  %1056 = vmatpush3.bf16.msra.mxu0 %v1098_v9 }
 0x54d   :  { %v663_v34 = vsel %vm193_vm1, %v657_v33, 0.0  ;;  %1057 = vmatprep.subr.bf16.mxu0 %v1344_v0 }
 0x54e   :  { %664 = vadd.xlane.f32.xlu1 %v663_v34 }
 0x550   :  { %1058 = vmatpush3.bf16.msra.mxu0 %v1099_v44 }
 0x5d9   :  { %v662_v35 = vpop.xlane.xlu0 %661 }
 0x5da   :  { %v667_v36 = vmul.f32 0.03125, %v662_v35 }
 0x5db   :  { %v665_v37 = vpop.xlane.xlu1 %664 }
 0x5dc   :  { %v669_v38 = vsub.f32 %v656_v31, %v667_v36  ;;  %v668_v39 = vmul.f32 0.03125, %v665_v37 }
 0x5de   :  { %v670_v40 = vsub.f32 %v657_v33, %v668_v39  ;;  %v671_v41 = vmul.f32 %v669_v38, %v669_v38 }
 0x5e0   :  { %v673_v42 = vsel %vm193_vm1, %v671_v41, 0.0  ;;  %v672_v43 = vmul.f32 %v670_v40, %v670_v40 }
 0x5e1   :  { %674 = vadd.xlane.f32.xlu0 %v673_v42 }
 0x5e2   :  { %v676_v7 = vsel %vm193_vm1, %v672_v43, 0.0 }
 0x5e3   :  { %677 = vadd.xlane.f32.xlu1 %v676_v7 }
 0x66e   :  { %v675_v45 = vpop.xlane.xlu0 %674 }
 0x66f   :  { %v679_v46 = vmul.f32 0.03125, %v675_v45 }
 0x670   :  { %v678_v47 = vpop.xlane.xlu1 %677 }
 0x671   :  { %v681_v48 = vadd.f32 1e-12, %v679_v46  ;;  %v680_v49 = vmul.f32 0.03125, %v678_v47 }
 0x673   :  { %1112 = vrsqrt.f32 %v681_v48  ;;  %v682_v50 = vadd.f32 1e-12, %v680_v49 }
 0x675   :  { %1114 = vrsqrt.f32 %v682_v50 }
 0x67d   :  { %v1113_v51 = vpop.eup %1112 }
 0x67e   :  { %v685_v53 = vmul.f32 %v1113_v51, %v669_v38 }
 0x67f   :  { %v1115_v54 = vpop.eup %1114 }
 0x680   :  { %v693_v56 = vmul.f32 %v957_v52, %v685_v53  ;;  %v686_v57 = vmul.f32 %v1115_v54, %v670_v40 }
 0x682   :  { %v694_v58 = vmul.f32 %v957_v52, %v686_v57  ;;  %v701_v59 = vadd.f32 %v958_v55, %v693_v56  ;;  %v969_v52 = vld [vmem:[%s1725_s17] ss:$0 sm:$0xff] }
 0x684   :  { %v702_v62 = vadd.f32 %v958_v55, %v694_v58  ;;  %v703_v63 = vadd.f32 %v701_v59, %v167_v60  ;;  %v970_v55 = vld [vmem:[%s1726_s18] ss:$0 sm:$0xff] }
 0x686   :  { %v704_v1 = vadd.f32 %v702_v62, %v168_v61 }
 0x688   :  { %v705_v2 = vpack.c.bf16 %v704_v1, %v703_v63 }
 0x68a   :  { %1060 = vmatmul.mubr.msk.bf16.vlgmr.msra.gmra.mrb[16].mxu0 %vm193_vm1, %v705_v2 }
 0x75d   :  { %v766_v10 = vpop.f32.mrb[16].mxu0 }
 0x75e   :  { %v767_v11 = vadd.f32 %v959_v8, %v766_v10  ;;  %v1061_v12 = vpop.f32.mrb[17].mxu0 }
 0x75f   :  { %v769_v13 = vpop.f32.mrb[18].mxu0 }
 0x760   :  { %v775_v14 = vmul.f32 0.70710677, %v767_v11  ;;  %v770_v15 = vadd.f32 %v959_v8, %v769_v13  ;;  %v1062_v16 = vpop.f32.mrb[19].mxu0  ;;  %v773_v20 = vmul.f32 0.5, %v767_v11 }
 0x762   :  { %1116 = verf.f32 %v775_v14  ;;  %v776_v17 = vmul.f32 0.70710677, %v770_v15  ;;  %v774_v21 = vmul.f32 0.5, %v770_v15 }
 0x764   :  { %1118 = verf.f32 %v776_v17 }
 0x76c   :  { %v1117_v0 = vpop.eup %1116 }
 0x76d   :  { %v779_v18 = vadd.f32 1.0, %v1117_v0 }
 0x76e   :  { %v1119_v19 = vpop.eup %1118 }
 0x76f   :  { %v780_v22 = vadd.f32 1.0, %v1119_v19  ;;  %v781_v23 = vmul.f32 %v779_v18, %v773_v20 }
 0x771   :  { %v782_v24 = vmul.f32 %v780_v22, %v774_v21 }
 0x773   :  { %v783_v25 = vpack.c.bf16 %v782_v24, %v781_v23 }
 0x775   :  { %1072 = vmatmul.mubr.msk.bf16.vlgmr.msra.gmra.mrb[16].mxu1 %vm823_vm4, %v783_v25 }
 0x848   :  { %v861_v27 = vpop.f32.mrb[16].mxu1 }
 0x849   :  { %v862_v28 = vadd.f32 %v963_v26, %v861_v27  ;;  %v1073_v29 = vpop.f32.mrb[17].mxu1 }
 0x84a   :  { %v864_v30 = vpop.f32.mrb[18].mxu1 }
 0x84b   :  { %v865_v31 = vadd.f32 %v963_v26, %v864_v30  ;;  %v1074_v32 = vpop.f32.mrb[19].mxu1  ;;  %v868_v33 = vadd.f32 %v862_v28, %v701_v59 }
 0x84d   :  { %v872_v34 = vsel %vm193_vm1, %v868_v33, 0.0  ;;  %v869_v35 = vadd.f32 %v865_v31, %v702_v62 }
 0x84e   :  { %873 = vadd.xlane.f32.xlu0 %v872_v34 }
 0x84f   :  { %v875_v36 = vsel %vm193_vm1, %v869_v35, 0.0 }
 0x850   :  { %876 = vadd.xlane.f32.xlu1 %v875_v36 }
 0x8db   :  { %v874_v37 = vpop.xlane.xlu0 %873 }
 0x8dc   :  { %v878_v38 = vmul.f32 0.03125, %v874_v37 }
 0x8dd   :  { %v877_v39 = vpop.xlane.xlu1 %876 }
 0x8de   :  { %v880_v40 = vsub.f32 %v868_v33, %v878_v38  ;;  %v879_v41 = vmul.f32 0.03125, %v877_v39 }
 0x8e0   :  { %v881_v42 = vsub.f32 %v869_v35, %v879_v41  ;;  %v882_v43 = vmul.f32 %v880_v40, %v880_v40 }
 0x8e2   :  { %v884_v7 = vsel %vm193_vm1, %v882_v43, 0.0  ;;  %v883_v9 = vmul.f32 %v881_v42, %v881_v42 }
 0x8e3   :  { %885 = vadd.xlane.f32.xlu0 %v884_v7 }
 0x8e4   :  { %v887_v44 = vsel %vm193_vm1, %v883_v9, 0.0 }
 0x8e5   :  { %888 = vadd.xlane.f32.xlu1 %v887_v44 }
 0x970   :  { %v886_v45 = vpop.xlane.xlu0 %885 }
 0x971   :  { %v890_v46 = vmul.f32 0.03125, %v886_v45 }
 0x972   :  { %v889_v47 = vpop.xlane.xlu1 %888 }
 0x973   :  { %v892_v48 = vadd.f32 1e-12, %v890_v46  ;;  %v891_v49 = vmul.f32 0.03125, %v889_v47 }
 0x975   :  { %1120 = vrsqrt.f32 %v892_v48  ;;  %v893_v50 = vadd.f32 1e-12, %v891_v49 }
 0x977   :  { %1122 = vrsqrt.f32 %v893_v50 }
 0x97f   :  { %v1121_v51 = vpop.eup %1120 }
 0x980   :  { %v896_v53 = vmul.f32 %v1121_v51, %v880_v40 }
 0x981   :  { %v1123_v54 = vpop.eup %1122 }
 0x982   :  { %v904_v56 = vmul.f32 %v969_v52, %v896_v53  ;;  %v897_v57 = vmul.f32 %v1123_v54, %v881_v42 }
 0x984   :  { %v905_v58 = vmul.f32 %v969_v52, %v897_v57  ;;  %v912_v59 = vadd.f32 %v970_v55, %v904_v56 }
 0x986   :  { %v913_v60 = vadd.f32 %v970_v55, %v905_v58  ;;  %914 = vst.msk [vmem:[#allocation16] sm:$0xff] %vm193_vm1, %v912_v59 }
 0x988   :  { %915 = vst.msk [vmem:[#allocation16 + $0x8] sm:$0xff] %vm193_vm1, %v913_v60 }
 0x989   :  { %1311 = shalt.err (!%p1308_p12)
}
 0x98a   :  { %s1312_s9 = scalar_lea.hbm %s1727_s19, 256 }
 0x98b   :  { %p1313_p13 = scmp.ne.s32.totalorder %s1727_s19, %s1312_s9  ;;  %p1316_p0 = scmp.lt.u32.totalorder %s1312_s9, %s1727_s19 }
 0x98d   :  { %p1318_p1 = pnand %p1316_p0, %p1313_p13 }
 0x98f   :  { %1321 = shalt.err (!%p1318_p1)
}
 0x990   :  { %s1347_s28 = smov 128   ;;  %s1348_s20 = smov 8  }
 0x991   :  { %927 = dma.vmem_to_hbm [thread:$0]  %s922_s23, 256, %s1727_s19, [#allocation4], %s1347_s28, %s1347_s28, %s1348_s20  }
 0x992   :  { %1332 = dma.done.wait [#allocation4], 256  }
 0x993   :  { %1333 = vsyncadd [#allocation4], 4294967040 }
 0x994   :  { %931 = vsyncpa [#allocation3], 1 }
 0x995   :  { %932 = vsyncpa [#allocation6], 1 }
 0x996   :  { %933 = vsyncpa [#allocation9], 1 }
 0x997   :  { %934 = vsyncpa [#allocation12], 1 }
 0x998   :  { %935 = vsyncpa [#allocation15], 1 }
 0x999   :  { %936 = vsyncpa [#allocation4], 1 }

</bundles_post_ra>
